<compile_context>
chip_gen: v7x
topology: tpu7x:2x2x1
jax: 0.10.0
libtpu: 0.0.40
codegen_flags: <defaults>
</compile_context>

<pallas_src>
import functools

import numpy as np
import jax
import jax.numpy as jnp
from jax.experimental import pallas as pl
from jax.experimental.pallas import tpu as pltpu

FUSED_KEYS = (
    "enc_w1", "enc_b1", "enc_w2", "enc_b2",
    "ha_w1", "ha_b1", "ha_w2", "ha_b2",
    "hd_w1", "hd_b1", "hd_w2", "hd_b2", "hd_w3", "hd_b3",
)

MAX_BLOCK_B = 512  # VMEM-safe batch block (activ. rows ~1.5KB f32 each -> <1MB/tile)


def _round_up(n, m):
    return ((n + m - 1) // m) * m


# ----------------------------------------------------------------------------
# Fused forward kernel: 7 matmuls total (4 base + 3 fused heads), softmax /
# log-softmax / argmax on masked 128-wide lanes, one lane-dense (B, out_lanes)
# f32 output slab: [act probs | speech probs | value | _ | logp_a | logp_s |
#                   mode_a | mode_s | zeros...].
# ----------------------------------------------------------------------------
def topk_policy_kernel(
    x_ref,
    enc_w1, enc_b1, enc_w2, enc_b2,
    ha_w1, ha_b1, ha_w2, ha_b2,
    hd_w1, hd_b1, hd_w2, hd_b2, hd_w3, hd_b3,
    out_ref,
    *, a0, a1,
):
    f32 = jnp.float32

    def lin(x, w_ref, b_ref):
        w = w_ref[...]
        # bf16 x bf16 -> f32 accumulation on the MXU; bias add stays f32.
        return jnp.dot(x.astype(w.dtype), w, preferred_element_type=f32) + b_ref[...]

    x = x_ref[...]

    # MLPBase.encoder
    h = jnp.tanh(lin(x, enc_w1, enc_b1))
    feat = jnp.tanh(lin(h, enc_w2, enc_b2))

    # MLPBase.hidden_actor -> actor_features
    h = jnp.tanh(lin(feat, ha_w1, ha_b1))
    actor = jnp.tanh(lin(h, ha_w2, ha_b2))

    # Fused heads (columns [0:2H]=actor_act, [2H:4H]=actor_speech, [4H:5H]=critic,
    # zero-padded to a multiple of 128 lanes).
    h1 = jnp.tanh(lin(actor, hd_w1, hd_b1))      # (B, HW)
    h2 = jnp.tanh(lin(h1, hd_w2, hd_b2))         # (B, HW)  (block-diagonal W2)
    z = lin(h2, hd_w3, hd_b3)                    # (B, out_lanes):
    #   lanes [0:a0]      = act logits
    #   lanes [a0:a0+a1]  = speech logits
    #   lane  a0+a1       = value
    #   lanes > a0+a1     = exactly 0 (all-zero W3 columns, zero bias)

    lanes = jax.lax.broadcasted_iota(jnp.int32, z.shape, 1)
    neg_big = jnp.float32(-1e30)
    int_big = jnp.iinfo(jnp.int32).max

    def categorical(lo, hi):
        # softmax / first-argmax / log_prob-of-mode restricted to lanes [lo, hi)
        mask = (lanes >= lo) & (lanes < hi)
        zm = jnp.where(mask, z, neg_big)
        m = jnp.max(zm, axis=-1, keepdims=True)
        e = jnp.exp(zm - m)                       # out-of-group lanes -> exp(-1e30)=0
        s = jnp.sum(e, axis=-1, keepdims=True)
        probs = e / s                             # exact: rows sum to 1 (f32 rounding)
        mode_lane = jnp.min(jnp.where(zm == m, lanes, int_big), axis=-1, keepdims=True)
        logp = -jnp.log(s)                        # == log_softmax[argmax] exactly
        return probs, mode_lane, logp

    off = a0 + a1
    probs_a, lane_a, lp_a = categorical(0, a0)
    probs_s, lane_s, lp_s = categorical(a0, off)
    mode_a = lane_a.astype(f32)
    mode_s = (lane_s - a0).astype(f32)

    # Scalars placed past lane `off`: value is already in z (lane off); zeros elsewhere.
    tail = jnp.where(lanes == off + 2, lp_a,
           jnp.where(lanes == off + 3, lp_s,
           jnp.where(lanes == off + 4, mode_a,
           jnp.where(lanes == off + 5, mode_s, 0.0))))

    # probs_a / probs_s are already zero outside their (disjoint) lane groups.
    out_ref[...] = jnp.where(lanes < off, probs_a + probs_s, z + tail)


# ----------------------------------------------------------------------------
# One-time weight fusion / padding / bf16 cast (do NOT call per step)
# ----------------------------------------------------------------------------
def prepare_fused_params(params, a0, a1, weight_dtype=jnp.bfloat16):
    """Concatenate the three head layer-1 weights, lay layer-2/3 out
    block-diagonally, zero-pad the fused head width to a multiple of 128 lanes,
    pad layer-3 output to a lane-dense slab, and cast weights to bf16."""
    H = params["ha_w2"].shape[0]
    HW = _round_up(5 * H, 128)                    # padded fused head width
    out_lanes = _round_up(a0 + a1 + 6, 128)       # lane-dense output slab width
    f32 = jnp.float32

    w1 = jnp.zeros((H, HW), f32)
    w1 = w1.at[:, 0:2 * H].set(params["aa_w1"])
    w1 = w1.at[:, 2 * H:4 * H].set(params["as_w1"])
    w1 = w1.at[:, 4 * H:5 * H].set(params["cr_w1"])
    b1 = jnp.zeros((1, HW), f32)
    b1 = b1.at[:, 0:2 * H].set(params["aa_b1"])
    b1 = b1.at[:, 2 * H:4 * H].set(params["as_b1"])
    b1 = b1.at[:, 4 * H:5 * H].set(params["cr_b1"])

    w2 = jnp.zeros((HW, HW), f32)
    w2 = w2.at[0:2 * H, 0:2 * H].set(params["aa_w2"])
    w2 = w2.at[2 * H:4 * H, 2 * H:4 * H].set(params["as_w2"])
    w2 = w2.at[4 * H:5 * H, 4 * H:5 * H].set(params["cr_w2"])
    b2 = jnp.zeros((1, HW), f32)
    b2 = b2.at[:, 0:2 * H].set(params["aa_b2"])
    b2 = b2.at[:, 2 * H:4 * H].set(params["as_b2"])
    b2 = b2.at[:, 4 * H:5 * H].set(params["cr_b2"])

    w3 = jnp.zeros((HW, out_lanes), f32)
    w3 = w3.at[0:2 * H, 0:a0].set(params["aa_w3"])
    w3 = w3.at[2 * H:4 * H, a0:a0 + a1].set(params["as_w3"])
    w3 = w3.at[4 * H:5 * H, a0 + a1:a0 + a1 + 1].set(params["cr_w3"])
    b3 = jnp.zeros((1, out_lanes), f32)
    b3 = b3.at[:, 0:a0].set(params["aa_b3"])
    b3 = b3.at[:, a0:a0 + a1].set(params["as_b3"])
    b3 = b3.at[:, a0 + a1:a0 + a1 + 1].set(params["cr_b3"])

    fused = {k: params[k] for k in
             ("enc_w1", "enc_b1", "enc_w2", "enc_b2", "ha_w1", "ha_b1", "ha_w2", "ha_b2")}
    fused.update(hd_w1=w1, hd_b1=b1, hd_w2=w2, hd_b2=b2, hd_w3=w3, hd_b3=b3)

    # Weights -> bf16 (half the DMA bytes); biases stay f32.
    fused = {k: (v.astype(weight_dtype) if "_w" in k else jnp.asarray(v, f32))
             for k, v in fused.items()}
    return jax.tree_util.tree_map(jnp.asarray, fused)


# ----------------------------------------------------------------------------
# Wrapper: deterministic TopKPolicy.forward
# ----------------------------------------------------------------------------
def topk_policy_forward(inputs, rnn_hxs, masks, fused_params, action_space):
    """Returns (value, actions, log_probs, rnn_hxs, (probs_act, probs_speech))."""
    del masks  # recurrent=False -> masks unused, rnn_hxs passes through
    a0, a1 = action_space
    b = inputs.shape[0]
    x = inputs.reshape(b, -1).astype(jnp.float32)
    in_dim = x.shape[1]
    out_lanes = fused_params["hd_b3"].shape[1]

    # Batch blocking: a single block at small B; VMEM-safe blocks (parallel
    # across TensorCores on v7x megacore) for large B.  Tail rows zero-padded.
    block_b = b if b <= MAX_BLOCK_B else MAX_BLOCK_B
    b_pad = _round_up(b, block_b)
    if b_pad != b:
        x = jnp.pad(x, ((0, b_pad - b), (0, 0)))
    grid = (b_pad // block_b,)

    weights = [fused_params[k] for k in FUSED_KEYS]
    # Weights: full-array blocks, constant index map -> resident in VMEM across
    # grid steps (no per-step re-DMA).
    in_specs = [pl.BlockSpec((block_b, in_dim), lambda i: (i, 0))]
    in_specs += [pl.BlockSpec(w.shape, lambda i: (0, 0)) for w in weights]
    out_spec = pl.BlockSpec((block_b, out_lanes), lambda i: (i, 0))

    kernel = functools.partial(topk_policy_kernel, a0=a0, a1=a1)
    out = pl.pallas_call(
        kernel,
        out_shape=jax.ShapeDtypeStruct((b_pad, out_lanes), jnp.float32),
        grid=grid,
        in_specs=in_specs,
        out_specs=out_spec,
        compiler_params=pltpu.CompilerParams(dimension_semantics=("parallel",)),
    )(x, *weights)
    out = out[:b]

    off = a0 + a1
    probs_a = out[:, :a0]
    probs_s = out[:, a0:off]
    value = out[:, off:off + 1]
    log_probs = out[:, off + 2:off + 4]
    actions = out[:, off + 4:off + 6].astype(jnp.int32)  # exact: small ints in f32
    return value, actions, log_probs, rnn_hxs, (probs_a, probs_s)


# ----------------------------------------------------------------------------
# Deterministic parameter init (orthogonal-like scaling, bias = 0)
# ----------------------------------------------------------------------------
def init_params(key, num_inputs, poly_n_codes, hidden, a0, a1):
    shapes = {
        "enc_w1": (num_inputs * poly_n_codes, hidden),
        "enc_w2": (hidden, num_inputs),
        "ha_w1": (num_inputs, hidden),
        "ha_w2": (hidden, hidden),
        "aa_w1": (hidden, 2 * hidden),
        "aa_w2": (2 * hidden, 2 * hidden),
        "aa_w3": (2 * hidden, a0),
        "as_w1": (hidden, 2 * hidden),
        "as_w2": (2 * hidden, 2 * hidden),
        "as_w3": (2 * hidden, a1),
        "cr_w1": (hidden, hidden),
        "cr_w2": (hidden, hidden),
        "cr_w3": (hidden, 1),
    }
    params = {}
    keys = jax.random.split(key, len(shapes))
    for k, (name, (fin, fout)) in zip(keys, shapes.items()):
        scale = np.sqrt(2.0) / np.sqrt(fin)
        params[name] = jax.random.normal(k, (fin, fout), jnp.float32) * scale
        params[name.replace("_w", "_b")] = jnp.zeros((1, fout), jnp.float32)
    return params


# ----------------------------------------------------------------------------
# Pure-JAX reference (unfused math, XLA) with the same bf16 weight precision
# ----------------------------------------------------------------------------
def ref_forward(inputs, params, a0, a1, weight_dtype=jnp.bfloat16):
    b = inputs.shape[0]
    x = inputs.reshape(b, -1).astype(jnp.float32)
    p = params

    def lin(x, w, bb):
        w = p[w].astype(weight_dtype)
        return jnp.dot(x.astype(weight_dtype), w,
                       preferred_element_type=jnp.float32) + p[bb]

    feat = jnp.tanh(lin(jnp.tanh(lin(x, "enc_w1", "enc_b1")), "enc_w2", "enc_b2"))
    actor = jnp.tanh(lin(jnp.tanh(lin(feat, "ha_w1", "ha_b1")), "ha_w2", "ha_b2"))
    act_logits = lin(jnp.tanh(lin(jnp.tanh(lin(actor, "aa_w1", "aa_b1")), "aa_w2", "aa_b2")), "aa_w3", "aa_b3")
    sp_logits = lin(jnp.tanh(lin(jnp.tanh(lin(actor, "as_w1", "as_b1")), "as_w2", "as_b2")), "as_w3", "as_b3")
    value = lin(jnp.tanh(lin(jnp.tanh(lin(actor, "cr_w1", "cr_b1")), "cr_w2", "cr_b2")), "cr_w3", "cr_b3")

    def cat(logits):
        probs = jax.nn.softmax(logits, axis=-1)
        logp = jax.nn.log_softmax(logits, axis=-1)
        mode = jnp.argmax(logits, axis=-1)
        sel = jnp.take_along_axis(logp, mode[:, None], axis=-1)
        return probs, mode.astype(jnp.int32), sel

    pa, ma, la = cat(act_logits)
    ps, ms, ls = cat(sp_logits)
    actions = jnp.stack([ma, ms], axis=-1)
    log_probs = jnp.concatenate([la, ls], axis=-1)
    return value, actions, log_probs, pa, ps


if __name__ == "__main__":
    # Small, module-consistent shapes:
    #   obs_shape = (poly_n_codes, num_inputs) = (4, 32)
    #   inputs: (B, poly_n_codes, num_inputs); action_space = (16, 12); hidden = 64
    B, POLY_N_CODES, NUM_INPUTS = 8, 4, 32
    HIDDEN = 64
    ACTION_SPACE = (16, 12)

    key = jax.random.PRNGKey(0)
    k_params, k_inputs = jax.random.split(key)

    params = init_params(k_params, NUM_INPUTS, POLY_N_CODES, HIDDEN, *ACTION_SPACE)
    fused_params = prepare_fused_params(params, *ACTION_SPACE)   # built ONCE

    inputs = jax.random.normal(k_inputs, (B, POLY_N_CODES, NUM_INPUTS), jnp.float32)
    rnn_hxs = jnp.zeros((B, 1), jnp.float32)   # recurrent_hidden_state_size == 1
    masks = jnp.ones((B, 1), jnp.float32)

    value, actions, log_probs, rnn_hxs_out, (probs_a, probs_s) = topk_policy_forward(
        inputs, rnn_hxs, masks, fused_params, ACTION_SPACE
    )
    jax.block_until_ready((value, actions, log_probs, rnn_hxs_out, probs_a, probs_s))

    # sanity check against pure-JAX (unfused, same bf16 weight precision) reference
    r_value, r_actions, r_logp, r_pa, r_ps = ref_forward(inputs, params, *ACTION_SPACE)
    assert value.shape == (B, 1) and actions.shape == (B, 2) and log_probs.shape == (B, 2)
    assert probs_a.shape == (B, ACTION_SPACE[0]) and probs_s.shape == (B, ACTION_SPACE[1])
    np.testing.assert_allclose(np.asarray(value), np.asarray(r_value), rtol=1e-3, atol=1e-3)
    np.testing.assert_array_equal(np.asarray(actions), np.asarray(r_actions))
    np.testing.assert_allclose(np.asarray(log_probs), np.asarray(r_logp), rtol=1e-3, atol=1e-3)
    np.testing.assert_allclose(np.asarray(probs_a), np.asarray(r_pa), rtol=2e-3, atol=1e-3)
    np.testing.assert_allclose(np.asarray(probs_s), np.asarray(r_ps), rtol=2e-3, atol=1e-3)
    # exact softmax normalization now (no approx reciprocal)
    np.testing.assert_allclose(np.asarray(probs_a).sum(-1), np.ones(B), rtol=1e-3)
    np.testing.assert_allclose(np.asarray(probs_s).sum(-1), np.ones(B), rtol=1e-3)

    print("KERNEL_OK")
</pallas_src>

<mosaic_0001>
module attributes {stable_mosaic.version = 11 : i64} {
  func.func @topk_policy_kernel(%arg0: i32, %arg1: memref<8x128xf32, #tpu.memory_space<vmem>>, %arg2: memref<128x64xbf16, #tpu.memory_space<vmem>>, %arg3: memref<1x64xf32, #tpu.memory_space<vmem>>, %arg4: memref<64x32xbf16, #tpu.memory_space<vmem>>, %arg5: memref<1x32xf32, #tpu.memory_space<vmem>>, %arg6: memref<32x64xbf16, #tpu.memory_space<vmem>>, %arg7: memref<1x64xf32, #tpu.memory_space<vmem>>, %arg8: memref<64x64xbf16, #tpu.memory_space<vmem>>, %arg9: memref<1x64xf32, #tpu.memory_space<vmem>>, %arg10: memref<64x384xbf16, #tpu.memory_space<vmem>>, %arg11: memref<1x384xf32, #tpu.memory_space<vmem>>, %arg12: memref<384x384xbf16, #tpu.memory_space<vmem>>, %arg13: memref<1x384xf32, #tpu.memory_space<vmem>>, %arg14: memref<384x128xbf16, #tpu.memory_space<vmem>>, %arg15: memref<1x128xf32, #tpu.memory_space<vmem>>, %arg16: memref<8x128xf32, #tpu.memory_space<vmem>>) attributes {dimension_semantics = [#tpu.dimension_semantics<parallel>], iteration_bounds = array<i64: 1>, scalar_prefetch = 0 : i64, scratch_operands = 0 : i64, tpu.core_type = #tpu.core_type<tc>, window_params = [{transform_indices = @transform_0, window_bounds = array<i64: 8, 128>}, {pipeline_mode = #tpu.pipeline_mode<synchronous>, transform_indices = @transform_1, window_bounds = array<i64: 128, 64>}, {pipeline_mode = #tpu.pipeline_mode<synchronous>, transform_indices = @transform_2, window_bounds = array<i64: 1, 64>}, {pipeline_mode = #tpu.pipeline_mode<synchronous>, transform_indices = @transform_3, window_bounds = array<i64: 64, 32>}, {pipeline_mode = #tpu.pipeline_mode<synchronous>, transform_indices = @transform_4, window_bounds = array<i64: 1, 32>}, {pipeline_mode = #tpu.pipeline_mode<synchronous>, transform_indices = @transform_5, window_bounds = array<i64: 32, 64>}, {pipeline_mode = #tpu.pipeline_mode<synchronous>, transform_indices = @transform_6, window_bounds = array<i64: 1, 64>}, {pipeline_mode = #tpu.pipeline_mode<synchronous>, transform_indices = @transform_7, window_bounds = array<i64: 64, 64>}, {pipeline_mode = #tpu.pipeline_mode<synchronous>, transform_indices = @transform_8, window_bounds = array<i64: 1, 64>}, {pipeline_mode = #tpu.pipeline_mode<synchronous>, transform_indices = @transform_9, window_bounds = array<i64: 64, 384>}, {pipeline_mode = #tpu.pipeline_mode<synchronous>, transform_indices = @transform_10, window_bounds = array<i64: 1, 384>}, {pipeline_mode = #tpu.pipeline_mode<synchronous>, transform_indices = @transform_11, window_bounds = array<i64: 384, 384>}, {pipeline_mode = #tpu.pipeline_mode<synchronous>, transform_indices = @transform_12, window_bounds = array<i64: 1, 384>}, {pipeline_mode = #tpu.pipeline_mode<synchronous>, transform_indices = @transform_13, window_bounds = array<i64: 384, 128>}, {pipeline_mode = #tpu.pipeline_mode<synchronous>, transform_indices = @transform_14, window_bounds = array<i64: 1, 128>}, {transform_indices = @transform_15, window_bounds = array<i64: 8, 128>}]} {
    %c0 = arith.constant 0 : index
    %c0_0 = arith.constant 0 : index
    %0 = vector.load %arg1[%c0, %c0_0] : memref<8x128xf32, #tpu.memory_space<vmem>>, vector<8x128xf32>
    %c0_1 = arith.constant 0 : index
    %c0_2 = arith.constant 0 : index
    %1 = vector.load %arg2[%c0_1, %c0_2] : memref<128x64xbf16, #tpu.memory_space<vmem>>, vector<128x64xbf16>
    %2 = arith.truncf %0 : vector<8x128xf32> to vector<8x128xbf16>
    %cst = arith.constant dense<0.000000e+00> : vector<8x64xf32>
    %3 = tpu.matmul %2, %1, %cst {dimension_numbers = #tpu.dot_dimension_numbers<[1], [0], [0], [1], [0, 0, 1, 1], [], []>} : vector<8x128xbf16>, vector<128x64xbf16>, vector<8x64xf32> -> vector<8x64xf32>
    %c0_3 = arith.constant 0 : index
    %c0_4 = arith.constant 0 : index
    %4 = vector.load %arg3[%c0_3, %c0_4] : memref<1x64xf32, #tpu.memory_space<vmem>>, vector<1x64xf32>
    %5 = vector.broadcast %4 : vector<1x64xf32> to vector<8x64xf32>
    %6 = arith.addf %3, %5 : vector<8x64xf32>
    %7 = math.tanh %6 : vector<8x64xf32>
    %c0_5 = arith.constant 0 : index
    %c0_6 = arith.constant 0 : index
    %8 = vector.load %arg4[%c0_5, %c0_6] : memref<64x32xbf16, #tpu.memory_space<vmem>>, vector<64x32xbf16>
    %9 = arith.truncf %7 : vector<8x64xf32> to vector<8x64xbf16>
    %cst_7 = arith.constant dense<0.000000e+00> : vector<8x32xf32>
    %10 = tpu.matmul %9, %8, %cst_7 {dimension_numbers = #tpu.dot_dimension_numbers<[1], [0], [0], [1], [0, 0, 1, 1], [], []>} : vector<8x64xbf16>, vector<64x32xbf16>, vector<8x32xf32> -> vector<8x32xf32>
    %c0_8 = arith.constant 0 : index
    %c0_9 = arith.constant 0 : index
    %11 = vector.load %arg5[%c0_8, %c0_9] : memref<1x32xf32, #tpu.memory_space<vmem>>, vector<1x32xf32>
    %12 = vector.broadcast %11 : vector<1x32xf32> to vector<8x32xf32>
    %13 = arith.addf %10, %12 : vector<8x32xf32>
    %14 = math.tanh %13 : vector<8x32xf32>
    %c0_10 = arith.constant 0 : index
    %c0_11 = arith.constant 0 : index
    %15 = vector.load %arg6[%c0_10, %c0_11] : memref<32x64xbf16, #tpu.memory_space<vmem>>, vector<32x64xbf16>
    %16 = arith.truncf %14 : vector<8x32xf32> to vector<8x32xbf16>
    %cst_12 = arith.constant dense<0.000000e+00> : vector<8x64xf32>
    %17 = tpu.matmul %16, %15, %cst_12 {dimension_numbers = #tpu.dot_dimension_numbers<[1], [0], [0], [1], [0, 0, 1, 1], [], []>} : vector<8x32xbf16>, vector<32x64xbf16>, vector<8x64xf32> -> vector<8x64xf32>
    %c0_13 = arith.constant 0 : index
    %c0_14 = arith.constant 0 : index
    %18 = vector.load %arg7[%c0_13, %c0_14] : memref<1x64xf32, #tpu.memory_space<vmem>>, vector<1x64xf32>
    %19 = vector.broadcast %18 : vector<1x64xf32> to vector<8x64xf32>
    %20 = arith.addf %17, %19 : vector<8x64xf32>
    %21 = math.tanh %20 : vector<8x64xf32>
    %c0_15 = arith.constant 0 : index
    %c0_16 = arith.constant 0 : index
    %22 = vector.load %arg8[%c0_15, %c0_16] : memref<64x64xbf16, #tpu.memory_space<vmem>>, vector<64x64xbf16>
    %23 = arith.truncf %21 : vector<8x64xf32> to vector<8x64xbf16>
    %cst_17 = arith.constant dense<0.000000e+00> : vector<8x64xf32>
    %24 = tpu.matmul %23, %22, %cst_17 {dimension_numbers = #tpu.dot_dimension_numbers<[1], [0], [0], [1], [0, 0, 1, 1], [], []>} : vector<8x64xbf16>, vector<64x64xbf16>, vector<8x64xf32> -> vector<8x64xf32>
    %c0_18 = arith.constant 0 : index
    %c0_19 = arith.constant 0 : index
    %25 = vector.load %arg9[%c0_18, %c0_19] : memref<1x64xf32, #tpu.memory_space<vmem>>, vector<1x64xf32>
    %26 = vector.broadcast %25 : vector<1x64xf32> to vector<8x64xf32>
    %27 = arith.addf %24, %26 : vector<8x64xf32>
    %28 = math.tanh %27 : vector<8x64xf32>
    %c0_20 = arith.constant 0 : index
    %c0_21 = arith.constant 0 : index
    %29 = vector.load %arg10[%c0_20, %c0_21] : memref<64x384xbf16, #tpu.memory_space<vmem>>, vector<64x384xbf16>
    %30 = arith.truncf %28 : vector<8x64xf32> to vector<8x64xbf16>
    %cst_22 = arith.constant dense<0.000000e+00> : vector<8x384xf32>
    %31 = tpu.matmul %30, %29, %cst_22 {dimension_numbers = #tpu.dot_dimension_numbers<[1], [0], [0], [1], [0, 0, 1, 1], [], []>} : vector<8x64xbf16>, vector<64x384xbf16>, vector<8x384xf32> -> vector<8x384xf32>
    %c0_23 = arith.constant 0 : index
    %c0_24 = arith.constant 0 : index
    %32 = vector.load %arg11[%c0_23, %c0_24] : memref<1x384xf32, #tpu.memory_space<vmem>>, vector<1x384xf32>
    %33 = vector.broadcast %32 : vector<1x384xf32> to vector<8x384xf32>
    %34 = arith.addf %31, %33 : vector<8x384xf32>
    %35 = math.tanh %34 : vector<8x384xf32>
    %c0_25 = arith.constant 0 : index
    %c0_26 = arith.constant 0 : index
    %36 = vector.load %arg12[%c0_25, %c0_26] : memref<384x384xbf16, #tpu.memory_space<vmem>>, vector<384x384xbf16>
    %37 = arith.truncf %35 : vector<8x384xf32> to vector<8x384xbf16>
    %cst_27 = arith.constant dense<0.000000e+00> : vector<8x384xf32>
    %38 = tpu.matmul %37, %36, %cst_27 {dimension_numbers = #tpu.dot_dimension_numbers<[1], [0], [0], [1], [0, 0, 1, 1], [], []>} : vector<8x384xbf16>, vector<384x384xbf16>, vector<8x384xf32> -> vector<8x384xf32>
    %c0_28 = arith.constant 0 : index
    %c0_29 = arith.constant 0 : index
    %39 = vector.load %arg13[%c0_28, %c0_29] : memref<1x384xf32, #tpu.memory_space<vmem>>, vector<1x384xf32>
    %40 = vector.broadcast %39 : vector<1x384xf32> to vector<8x384xf32>
    %41 = arith.addf %38, %40 : vector<8x384xf32>
    %42 = math.tanh %41 : vector<8x384xf32>
    %c0_30 = arith.constant 0 : index
    %c0_31 = arith.constant 0 : index
    %43 = vector.load %arg14[%c0_30, %c0_31] : memref<384x128xbf16, #tpu.memory_space<vmem>>, vector<384x128xbf16>
    %44 = arith.truncf %42 : vector<8x384xf32> to vector<8x384xbf16>
    %cst_32 = arith.constant dense<0.000000e+00> : vector<8x128xf32>
    %45 = tpu.matmul %44, %43, %cst_32 {dimension_numbers = #tpu.dot_dimension_numbers<[1], [0], [0], [1], [0, 0, 1, 1], [], []>} : vector<8x384xbf16>, vector<384x128xbf16>, vector<8x128xf32> -> vector<8x128xf32>
    %c0_33 = arith.constant 0 : index
    %c0_34 = arith.constant 0 : index
    %46 = vector.load %arg15[%c0_33, %c0_34] : memref<1x128xf32, #tpu.memory_space<vmem>>, vector<1x128xf32>
    %47 = vector.broadcast %46 : vector<1x128xf32> to vector<8x128xf32>
    %48 = arith.addf %45, %47 : vector<8x128xf32>
    %49 = tpu.iota {dimensions = array<i32: 1>} : vector<8x128xi32>
    %c0_i32 = arith.constant 0 : i32
    %50 = vector.broadcast %c0_i32 : i32 to vector<8x128xi32>
    %51 = arith.cmpi sge, %49, %50 : vector<8x128xi32>
    %c16_i32 = arith.constant 16 : i32
    %52 = vector.broadcast %c16_i32 : i32 to vector<8x128xi32>
    %53 = arith.cmpi slt, %49, %52 : vector<8x128xi32>
    %54 = arith.andi %51, %53 : vector<8x128xi1>
    %cst_35 = arith.constant -1.000000e+30 : f32
    %55 = vector.broadcast %cst_35 : f32 to vector<8x128xf32>
    %56 = arith.select %54, %48, %55 : vector<8x128xi1>, vector<8x128xf32>
    %cst_36 = arith.constant dense<0xFF800000> : vector<8xf32>
    %57 = vector.multi_reduction <maximumf>, %56, %cst_36 [1] : vector<8x128xf32> to vector<8xf32>
    %58 = vector.shape_cast %57 : vector<8xf32> to vector<8x1xf32>
    %59 = vector.broadcast %58 : vector<8x1xf32> to vector<8x128xf32>
    %60 = arith.subf %56, %59 : vector<8x128xf32>
    %61 = math.exp %60 : vector<8x128xf32>
    %cst_37 = arith.constant dense<0.000000e+00> : vector<8xf32>
    %62 = vector.multi_reduction <add>, %61, %cst_37 [1] : vector<8x128xf32> to vector<8xf32>
    %63 = vector.shape_cast %62 : vector<8xf32> to vector<8x1xf32>
    %64 = vector.broadcast %63 : vector<8x1xf32> to vector<8x128xf32>
    %65 = arith.divf %61, %64 : vector<8x128xf32>
    %66 = vector.broadcast %58 : vector<8x1xf32> to vector<8x128xf32>
    %67 = arith.cmpf oeq, %56, %66 : vector<8x128xf32>
    %c2147483647_i32 = arith.constant 2147483647 : i32
    %68 = vector.broadcast %c2147483647_i32 : i32 to vector<8x128xi32>
    %69 = arith.select %67, %49, %68 : vector<8x128xi1>, vector<8x128xi32>
    %cst_38 = arith.constant dense<2147483647> : vector<8xi32>
    %70 = vector.multi_reduction <minsi>, %69, %cst_38 [1] : vector<8x128xi32> to vector<8xi32>
    %71 = vector.shape_cast %70 : vector<8xi32> to vector<8x1xi32>
    %72 = math.log %63 : vector<8x1xf32>
    %cst_39 = arith.constant 0.000000e+00 : f32
    %73 = vector.broadcast %cst_39 : f32 to vector<8x1xf32>
    %74 = arith.subf %73, %72 : vector<8x1xf32>
    %c16_i32_40 = arith.constant 16 : i32
    %75 = vector.broadcast %c16_i32_40 : i32 to vector<8x128xi32>
    %76 = arith.cmpi sge, %49, %75 : vector<8x128xi32>
    %c28_i32 = arith.constant 28 : i32
    %77 = vector.broadcast %c28_i32 : i32 to vector<8x128xi32>
    %78 = arith.cmpi slt, %49, %77 : vector<8x128xi32>
    %79 = arith.andi %76, %78 : vector<8x128xi1>
    %cst_41 = arith.constant -1.000000e+30 : f32
    %80 = vector.broadcast %cst_41 : f32 to vector<8x128xf32>
    %81 = arith.select %79, %48, %80 : vector<8x128xi1>, vector<8x128xf32>
    %cst_42 = arith.constant dense<0xFF800000> : vector<8xf32>
    %82 = vector.multi_reduction <maximumf>, %81, %cst_42 [1] : vector<8x128xf32> to vector<8xf32>
    %83 = vector.shape_cast %82 : vector<8xf32> to vector<8x1xf32>
    %84 = vector.broadcast %83 : vector<8x1xf32> to vector<8x128xf32>
    %85 = arith.subf %81, %84 : vector<8x128xf32>
    %86 = math.exp %85 : vector<8x128xf32>
    %cst_43 = arith.constant dense<0.000000e+00> : vector<8xf32>
    %87 = vector.multi_reduction <add>, %86, %cst_43 [1] : vector<8x128xf32> to vector<8xf32>
    %88 = vector.shape_cast %87 : vector<8xf32> to vector<8x1xf32>
    %89 = vector.broadcast %88 : vector<8x1xf32> to vector<8x128xf32>
    %90 = arith.divf %86, %89 : vector<8x128xf32>
    %91 = vector.broadcast %83 : vector<8x1xf32> to vector<8x128xf32>
    %92 = arith.cmpf oeq, %81, %91 : vector<8x128xf32>
    %c2147483647_i32_44 = arith.constant 2147483647 : i32
    %93 = vector.broadcast %c2147483647_i32_44 : i32 to vector<8x128xi32>
    %94 = arith.select %92, %49, %93 : vector<8x128xi1>, vector<8x128xi32>
    %cst_45 = arith.constant dense<2147483647> : vector<8xi32>
    %95 = vector.multi_reduction <minsi>, %94, %cst_45 [1] : vector<8x128xi32> to vector<8xi32>
    %96 = vector.shape_cast %95 : vector<8xi32> to vector<8x1xi32>
    %97 = math.log %88 : vector<8x1xf32>
    %cst_46 = arith.constant 0.000000e+00 : f32
    %98 = vector.broadcast %cst_46 : f32 to vector<8x1xf32>
    %99 = arith.subf %98, %97 : vector<8x1xf32>
    %100 = arith.sitofp %71 : vector<8x1xi32> to vector<8x1xf32>
    %c16_i32_47 = arith.constant 16 : i32
    %101 = vector.broadcast %c16_i32_47 : i32 to vector<8x1xi32>
    %102 = arith.subi %96, %101 : vector<8x1xi32>
    %103 = arith.sitofp %102 : vector<8x1xi32> to vector<8x1xf32>
    %c30_i32 = arith.constant 30 : i32
    %104 = vector.broadcast %c30_i32 : i32 to vector<8x128xi32>
    %105 = arith.cmpi eq, %49, %104 : vector<8x128xi32>
    %c31_i32 = arith.constant 31 : i32
    %106 = vector.broadcast %c31_i32 : i32 to vector<8x128xi32>
    %107 = arith.cmpi eq, %49, %106 : vector<8x128xi32>
    %c32_i32 = arith.constant 32 : i32
    %108 = vector.broadcast %c32_i32 : i32 to vector<8x128xi32>
    %109 = arith.cmpi eq, %49, %108 : vector<8x128xi32>
    %c33_i32 = arith.constant 33 : i32
    %110 = vector.broadcast %c33_i32 : i32 to vector<8x128xi32>
    %111 = arith.cmpi eq, %49, %110 : vector<8x128xi32>
    %cst_48 = arith.constant 0.000000e+00 : f32
    %112 = vector.shape_cast %103 : vector<8x1xf32> to vector<8x1xf32>
    %113 = vector.broadcast %112 : vector<8x1xf32> to vector<8x128xf32>
    %114 = vector.broadcast %cst_48 : f32 to vector<8x128xf32>
    %115 = arith.select %111, %113, %114 : vector<8x128xi1>, vector<8x128xf32>
    %116 = vector.shape_cast %100 : vector<8x1xf32> to vector<8x1xf32>
    %117 = vector.broadcast %116 : vector<8x1xf32> to vector<8x128xf32>
    %118 = arith.select %109, %117, %115 : vector<8x128xi1>, vector<8x128xf32>
    %119 = vector.shape_cast %99 : vector<8x1xf32> to vector<8x1xf32>
    %120 = vector.broadcast %119 : vector<8x1xf32> to vector<8x128xf32>
    %121 = arith.select %107, %120, %118 : vector<8x128xi1>, vector<8x128xf32>
    %122 = vector.shape_cast %74 : vector<8x1xf32> to vector<8x1xf32>
    %123 = vector.broadcast %122 : vector<8x1xf32> to vector<8x128xf32>
    %124 = arith.select %105, %123, %121 : vector<8x128xi1>, vector<8x128xf32>
    %c28_i32_49 = arith.constant 28 : i32
    %125 = vector.broadcast %c28_i32_49 : i32 to vector<8x128xi32>
    %126 = arith.cmpi slt, %49, %125 : vector<8x128xi32>
    %127 = arith.addf %65, %90 : vector<8x128xf32>
    %128 = arith.addf %48, %124 : vector<8x128xf32>
    %129 = arith.select %126, %127, %128 : vector<8x128xi1>, vector<8x128xf32>
    %c0_50 = arith.constant 0 : index
    %c0_51 = arith.constant 0 : index
    %130 = vector.load %arg16[%c0_50, %c0_51] : memref<8x128xf32, #tpu.memory_space<vmem>>, vector<8x128xf32>
    tpu.vector_store %arg16[%c0_50, %c0_51], %129 {strides = array<i32>} : memref<8x128xf32, #tpu.memory_space<vmem>>, vector<8x128xf32>,
    return
  }
  func.func @transform_0(%arg0: i32) -> (i32, i32) {
    %c0_i32 = arith.constant 0 : i32
    %c0_i32_0 = arith.constant 0 : i32
    return %arg0, %c0_i32 : i32, i32
  }
  func.func @transform_1(%arg0: i32) -> (i32, i32) {
    %c0_i32 = arith.constant 0 : i32
    %c0_i32_0 = arith.constant 0 : i32
    %c0_i32_1 = arith.constant 0 : i32
    return %c0_i32, %c0_i32_0 : i32, i32
  }
  func.func @transform_2(%arg0: i32) -> (i32, i32) {
    %c0_i32 = arith.constant 0 : i32
    %c0_i32_0 = arith.constant 0 : i32
    %c0_i32_1 = arith.constant 0 : i32
    return %c0_i32, %c0_i32_0 : i32, i32
  }
  func.func @transform_3(%arg0: i32) -> (i32, i32) {
    %c0_i32 = arith.constant 0 : i32
    %c0_i32_0 = arith.constant 0 : i32
    %c0_i32_1 = arith.constant 0 : i32
    return %c0_i32, %c0_i32_0 : i32, i32
  }
  func.func @transform_4(%arg0: i32) -> (i32, i32) {
    %c0_i32 = arith.constant 0 : i32
    %c0_i32_0 = arith.constant 0 : i32
    %c0_i32_1 = arith.constant 0 : i32
    return %c0_i32, %c0_i32_0 : i32, i32
  }
  func.func @transform_5(%arg0: i32) -> (i32, i32) {
    %c0_i32 = arith.constant 0 : i32
    %c0_i32_0 = arith.constant 0 : i32
    %c0_i32_1 = arith.constant 0 : i32
    return %c0_i32, %c0_i32_0 : i32, i32
  }
  func.func @transform_6(%arg0: i32) -> (i32, i32) {
    %c0_i32 = arith.constant 0 : i32
    %c0_i32_0 = arith.constant 0 : i32
    %c0_i32_1 = arith.constant 0 : i32
    return %c0_i32, %c0_i32_0 : i32, i32
  }
  func.func @transform_7(%arg0: i32) -> (i32, i32) {
    %c0_i32 = arith.constant 0 : i32
    %c0_i32_0 = arith.constant 0 : i32
    %c0_i32_1 = arith.constant 0 : i32
    return %c0_i32, %c0_i32_0 : i32, i32
  }
  func.func @transform_8(%arg0: i32) -> (i32, i32) {
    %c0_i32 = arith.constant 0 : i32
    %c0_i32_0 = arith.constant 0 : i32
    %c0_i32_1 = arith.constant 0 : i32
    return %c0_i32, %c0_i32_0 : i32, i32
  }
  func.func @transform_9(%arg0: i32) -> (i32, i32) {
    %c0_i32 = arith.constant 0 : i32
    %c0_i32_0 = arith.constant 0 : i32
    %c0_i32_1 = arith.constant 0 : i32
    return %c0_i32, %c0_i32_0 : i32, i32
  }
  func.func @transform_10(%arg0: i32) -> (i32, i32) {
    %c0_i32 = arith.constant 0 : i32
    %c0_i32_0 = arith.constant 0 : i32
    %c0_i32_1 = arith.constant 0 : i32
    return %c0_i32, %c0_i32_0 : i32, i32
  }
  func.func @transform_11(%arg0: i32) -> (i32, i32) {
    %c0_i32 = arith.constant 0 : i32
    %c0_i32_0 = arith.constant 0 : i32
    %c0_i32_1 = arith.constant 0 : i32
    return %c0_i32, %c0_i32_0 : i32, i32
  }
  func.func @transform_12(%arg0: i32) -> (i32, i32) {
    %c0_i32 = arith.constant 0 : i32
    %c0_i32_0 = arith.constant 0 : i32
    %c0_i32_1 = arith.constant 0 : i32
    return %c0_i32, %c0_i32_0 : i32, i32
  }
  func.func @transform_13(%arg0: i32) -> (i32, i32) {
    %c0_i32 = arith.constant 0 : i32
    %c0_i32_0 = arith.constant 0 : i32
    %c0_i32_1 = arith.constant 0 : i32
    return %c0_i32, %c0_i32_0 : i32, i32
  }
  func.func @transform_14(%arg0: i32) -> (i32, i32) {
    %c0_i32 = arith.constant 0 : i32
    %c0_i32_0 = arith.constant 0 : i32
    %c0_i32_1 = arith.constant 0 : i32
    return %c0_i32, %c0_i32_0 : i32, i32
  }
  func.func @transform_15(%arg0: i32) -> (i32, i32) {
    %c0_i32 = arith.constant 0 : i32
    %c0_i32_0 = arith.constant 0 : i32
    return %arg0, %c0_i32 : i32, i32
  }
}

</mosaic_0001>

<bundles_post_ra>
// kernel: tpu_custom_call.1
= control target key start
LH: loop header
LB: loop body
LE: loop exit
PB: predicated region body
PF: predicated region fallthrough
CT: control target
= control target key end

     0   :  { %20 = vsyncpa [#allocation3], 0  ;;  %s3012_s0 = inlined_call_operand.hbm [shape: f32[8,128], index: 0, kind: input, shape index: {}]   ;;  %s3013_s1 = inlined_call_operand.vmem [shape: bf16[128,64], index: 1, kind: input, shape index: {}]   ;;  %s3014_s2 = inlined_call_operand.vmem [shape: f32[1,64], index: 2, kind: input, shape index: {}]   ;;  %s3015_s3 = inlined_call_operand.vmem [shape: bf16[64,32], index: 3, kind: input, shape index: {}]   ;;  %s3016_s4 = inlined_call_operand.hbm [shape: f32[1,32], index: 4, kind: input, shape index: {}]   ;;  %s3017_s5 = inlined_call_operand.hbm [shape: bf16[32,64], index: 5, kind: input, shape index: {}]   ;;  %s3018_s6 = inlined_call_operand.hbm [shape: f32[1,64], index: 6, kind: input, shape index: {}]   ;;  %s3019_s7 = inlined_call_operand.hbm [shape: bf16[64,64], index: 7, kind: input, shape index: {}]   ;;  %s3020_s8 = inlined_call_operand.hbm [shape: f32[1,64], index: 8, kind: input, shape index: {}]   ;;  %s3021_s9 = inlined_call_operand.hbm [shape: bf16[64,384], index: 9, kind: input, shape index: {}]   ;;  %s3022_s10 = inlined_call_operand.hbm [shape: f32[1,384], index: 10, kind: input, shape index: {}]   ;;  %s3023_s11 = inlined_call_operand.hbm [shape: bf16[384,384], index: 11, kind: input, shape index: {}]   ;;  %s3024_s12 = inlined_call_operand.hbm [shape: f32[1,384], index: 12, kind: input, shape index: {}]   ;;  %s3025_s13 = inlined_call_operand.vmem [shape: bf16[384,128], index: 13, kind: input, shape index: {}]   ;;  %s3026_s14 = inlined_call_operand.vmem [shape: f32[1,128], index: 14, kind: input, shape index: {}]   ;;  %s3027_s15 = inlined_call_operand.hbm [shape: f32[8,128], index: 15, kind: output, shape index: {}]  }
   0x1   :  { %21 = vsyncpa [#allocation6], 0 }
   0x2   :  { %22 = vsyncpa [#allocation9], 0 }
   0x3   :  { %23 = vsyncpa [#allocation12], 0 }
   0x4   :  { %24 = vsyncpa [#allocation15], 0 }
   0x5   :  { %25 = vsyncpa [#allocation18], 0 }
   0x6   :  { %26 = vsyncpa [#allocation4], 0  ;;  %s2557_s18 = smov [#allocation5]   ;;  %s2558_s20 = smov [#allocation8]  }
   0x7   :  { %s49_s19 = sshll.u32 %s2557_s18, 4  ;;  %s71_s21 = sshll.u32 %s2558_s20, 4  ;;  %s50_s19 = int_to_ptr.vmem [resolvable:$true] %s49_s19  ;;  %s72_s21 = int_to_ptr.vmem [resolvable:$true] %s71_s21 }
   0x8   :  { %s2301_s24 = scalar_lea.hbm %s3016_s4, 16 }
   0x9   :  { %p2302_p0 = scmp.ne.s32.totalorder %s3016_s4, %s2301_s24  ;;  %p2305_p1 = scmp.lt.u32.totalorder %s2301_s24, %s3016_s4 }
   0xb   :  { %p2307_p2 = pnand %p2305_p1, %p2302_p0 }
   0xd   :  { %2310 = shalt.err (!%p2307_p2)
}
   0xe   :  { %s2311_s29 = scalar_lea.vmem %s50_s19, 16  ;;  %s2315_s30 = scalar_lea.vmem %s50_s19, 32 }
   0xf   :  { %p2312_p3 = scmp.ne.s32.totalorder %s50_s19, %s2311_s29  ;;  %p2316_p4 = scmp.lt.s32.totalorder %s50_s19, %s50_s19 }
  0x10   :  { %p2317_p5 = scmp.lt.s32.totalorder %s2315_s30, %s2311_s29 }
  0x12   :  { %p2318_p6 = por %p2317_p5, %p2316_p4 }
  0x14   :  { %p2319_p7 = pnand %p2318_p6, %p2312_p3 }
  0x16   :  { %2322 = shalt.err (!%p2319_p7)
}
  0x17   :  { %52 = dma.hbm_to_vmem [thread:$0]  %s3016_s4, 16, %s50_s19, [#allocation6]  }
  0x18   :  { %s2323_s22 = scalar_lea.hbm %s3018_s6, 16 }
  0x19   :  { %p2324_p8 = scmp.ne.s32.totalorder %s3018_s6, %s2323_s22  ;;  %p2327_p9 = scmp.lt.u32.totalorder %s2323_s22, %s3018_s6 }
  0x1b   :  { %p2329_p10 = pnand %p2327_p9, %p2324_p8 }
  0x1d   :  { %2332 = shalt.err (!%p2329_p10)
}
  0x1e   :  { %s2333_s27 = scalar_lea.vmem %s72_s21, 16  ;;  %s2337_s28 = scalar_lea.vmem %s72_s21, 32 }
  0x1f   :  { %p2334_p11 = scmp.ne.s32.totalorder %s72_s21, %s2333_s27  ;;  %p2338_p12 = scmp.lt.s32.totalorder %s72_s21, %s72_s21 }
  0x20   :  { %p2339_p13 = scmp.lt.s32.totalorder %s2337_s28, %s2333_s27 }
  0x22   :  { %p2340_p0 = por %p2339_p13, %p2338_p12 }
  0x24   :  { %p2341_p1 = pnand %p2340_p0, %p2334_p11 }
  0x26   :  { %2344 = shalt.err (!%p2341_p1)
}
  0x27   :  { %74 = dma.hbm_to_vmem [thread:$0]  %s3018_s6, 16, %s72_s21, [#allocation9]  }
  0x28   :  { %s2559_s29 = smov [#allocation11]   ;;  %s2560_s16 = smov [#allocation14]  }
  0x29   :  { %s93_s30 = sshll.u32 %s2559_s29, 4  ;;  %s115_s17 = sshll.u32 %s2560_s16, 4  ;;  %s94_s30 = int_to_ptr.vmem [resolvable:$true] %s93_s30  ;;  %s116_s17 = int_to_ptr.vmem [resolvable:$true] %s115_s17 }
  0x2a   :  { %s2345_s22 = scalar_lea.hbm %s3020_s8, 16 }
  0x2b   :  { %p2346_p2 = scmp.ne.s32.totalorder %s3020_s8, %s2345_s22  ;;  %p2349_p3 = scmp.lt.u32.totalorder %s2345_s22, %s3020_s8 }
  0x2d   :  { %p2351_p4 = pnand %p2349_p3, %p2346_p2 }
  0x2f   :  { %2354 = shalt.err (!%p2351_p4)
}
  0x30   :  { %s2355_s6 = scalar_lea.vmem %s94_s30, 16  ;;  %s2359_s21 = scalar_lea.vmem %s94_s30, 32 }
  0x31   :  { %p2356_p5 = scmp.ne.s32.totalorder %s94_s30, %s2355_s6  ;;  %p2360_p6 = scmp.lt.s32.totalorder %s94_s30, %s94_s30 }
  0x32   :  { %p2361_p7 = scmp.lt.s32.totalorder %s2359_s21, %s2355_s6 }
  0x34   :  { %p2362_p8 = por %p2361_p7, %p2360_p6 }
  0x36   :  { %p2363_p9 = pnand %p2362_p8, %p2356_p5 }
  0x38   :  { %2366 = shalt.err (!%p2363_p9)
}
  0x39   :  { %96 = dma.hbm_to_vmem [thread:$0]  %s3020_s8, 16, %s94_s30, [#allocation12]  }
  0x3a   :  { %s2367_s29 = scalar_lea.hbm %s3022_s10, 48 }
  0x3b   :  { %p2368_p10 = scmp.ne.s32.totalorder %s3022_s10, %s2367_s29  ;;  %p2371_p11 = scmp.lt.u32.totalorder %s2367_s29, %s3022_s10 }
  0x3d   :  { %p2373_p12 = pnand %p2371_p11, %p2368_p10 }
  0x3f   :  { %2376 = shalt.err (!%p2373_p12)
}
  0x40   :  { %s2377_s23 = scalar_lea.vmem %s116_s17, 48  ;;  %s2381_s24 = scalar_lea.vmem %s116_s17, 64 }
  0x41   :  { %p2378_p13 = scmp.ne.s32.totalorder %s116_s17, %s2377_s23  ;;  %p2382_p0 = scmp.lt.s32.totalorder %s116_s17, %s116_s17 }
  0x42   :  { %p2383_p1 = scmp.lt.s32.totalorder %s2381_s24, %s2377_s23 }
  0x44   :  { %p2384_p2 = por %p2383_p1, %p2382_p0 }
  0x46   :  { %p2385_p3 = pnand %p2384_p2, %p2378_p13 }
  0x48   :  { %2388 = shalt.err (!%p2385_p3)
}
  0x49   :  { %118 = dma.hbm_to_vmem [thread:$0]  %s3022_s10, 48, %s116_s17, [#allocation15]  }
  0x4a   :  { %s2561_s25 = smov [#allocation2]   ;;  %s2562_s6 = smov [#allocation7]  }
  0x4b   :  { %s33_s26 = sshll.u32 %s2561_s25, 4  ;;  %s58_s21 = sshll.u32 %s2562_s6, 4  ;;  %s34_s26 = int_to_ptr.vmem [resolvable:$true] %s33_s26  ;;  %s2703_s21 = int_to_ptr.vmem [resolvable:$true] %s58_s21 }
  0x4c   :  { %s2389_s4 = scalar_lea.hbm %s3012_s0, 128 }
  0x4d   :  { %p2390_p4 = scmp.ne.s32.totalorder %s3012_s0, %s2389_s4  ;;  %p2393_p5 = scmp.lt.u32.totalorder %s2389_s4, %s3012_s0 }
  0x4f   :  { %p2395_p6 = pnand %p2393_p5, %p2390_p4 }
  0x51   :  { %2398 = shalt.err (!%p2395_p6)
}
  0x52   :  { %s2399_s10 = scalar_lea.vmem %s34_s26, 128  ;;  %p2404_p8 = scmp.lt.s32.totalorder %s34_s26, %s34_s26 }
  0x53   :  { %p2400_p7 = scmp.ne.s32.totalorder %s34_s26, %s2399_s10  ;;  %p2405_p9 = scmp.lt.s32.totalorder %s2399_s10, %s2399_s10 }
  0x55   :  { %p2406_p10 = por %p2405_p9, %p2404_p8 }
  0x57   :  { %p2407_p11 = pnand %p2406_p10, %p2400_p7 }
  0x59   :  { %2410 = shalt.err (!%p2407_p11)
}
  0x5a   :  { %36 = dma.hbm_to_vmem [thread:$0]  %s3012_s0, 128, %s34_s26, [#allocation3]  }
  0x5b   :  { %s2411_s24 = scalar_lea.hbm %s3017_s5, 256 }
  0x5c   :  { %p2412_p12 = scmp.ne.s32.totalorder %s3017_s5, %s2411_s24  ;;  %p2415_p13 = scmp.lt.u32.totalorder %s2411_s24, %s3017_s5 }
  0x5e   :  { %p2417_p0 = pnand %p2415_p13, %p2412_p12 }
  0x60   :  { %2420 = shalt.err (!%p2417_p0)
}
  0x61   :  { %s2421_s27 = scalar_lea.vmem %s2703_s21, 256  ;;  %p2426_p2 = scmp.lt.s32.totalorder %s2703_s21, %s2703_s21 }
  0x62   :  { %p2422_p1 = scmp.ne.s32.totalorder %s2703_s21, %s2421_s27  ;;  %p2427_p3 = scmp.lt.s32.totalorder %s2421_s27, %s2421_s27 }
  0x64   :  { %p2428_p4 = por %p2427_p3, %p2426_p2 }
  0x66   :  { %p2429_p5 = pnand %p2428_p4, %p2422_p1 }
  0x68   :  { %2432 = shalt.err (!%p2429_p5)
}
  0x69   :  { %s2563_s0 = smov 64   ;;  %s2564_s26 = smov 4  }
  0x6a   :  { %64 = dma.hbm_to_vmem [thread:$0]  %s3017_s5, 256, %s2703_s21, [#allocation6], %s2563_s0, %s2563_s0, %s2564_s26  }
  0x6b   :  { %s2565_s19 = smov [#allocation10]   ;;  %s2566_s16 = smov [#allocation13]  }
  0x6c   :  { %s80_s29 = sshll.u32 %s2565_s19, 4  ;;  %s102_s18 = sshll.u32 %s2566_s16, 4  ;;  %s81_s29 = int_to_ptr.vmem [resolvable:$true] %s80_s29  ;;  %s2734_s18 = int_to_ptr.vmem [resolvable:$true] %s102_s18 }
  0x6d   :  { %s2433_s20 = scalar_lea.hbm %s3019_s7, 512 }
  0x6e   :  { %p2434_p6 = scmp.ne.s32.totalorder %s3019_s7, %s2433_s20  ;;  %p2437_p7 = scmp.lt.u32.totalorder %s2433_s20, %s3019_s7 }
  0x70   :  { %p2439_p8 = pnand %p2437_p7, %p2434_p6 }
  0x72   :  { %2442 = shalt.err (!%p2439_p8)
}
  0x73   :  { %s2443_s5 = scalar_lea.vmem %s81_s29, 512  ;;  %p2448_p10 = scmp.lt.s32.totalorder %s81_s29, %s81_s29 }
  0x74   :  { %p2444_p9 = scmp.ne.s32.totalorder %s81_s29, %s2443_s5  ;;  %p2449_p11 = scmp.lt.s32.totalorder %s2443_s5, %s2443_s5 }
  0x76   :  { %p2450_p12 = por %p2449_p11, %p2448_p10 }
  0x78   :  { %p2451_p13 = pnand %p2450_p12, %p2444_p9 }
  0x7a   :  { %2454 = shalt.err (!%p2451_p13)
}
  0x7b   :  { %86 = dma.hbm_to_vmem [thread:$0]  %s3019_s7, 512, %s81_s29, [#allocation9], %s2563_s0, %s2563_s0, %s2564_s26  }
  0x7c   :  { %s2455_s27 = scalar_lea.hbm %s3021_s9, 1536 }
  0x7d   :  { %p2456_p0 = scmp.ne.s32.totalorder %s3021_s9, %s2455_s27  ;;  %p2459_p1 = scmp.lt.u32.totalorder %s2455_s27, %s3021_s9 }
  0x7f   :  { %p2461_p2 = pnand %p2459_p1, %p2456_p0 }
  0x81   :  { %2464 = shalt.err (!%p2461_p2)
}
  0x82   :  { %s2465_s10 = scalar_lea.vmem %s2734_s18, 1536  ;;  %p2470_p4 = scmp.lt.s32.totalorder %s2734_s18, %s2734_s18 }
  0x83   :  { %p2466_p3 = scmp.ne.s32.totalorder %s2734_s18, %s2465_s10  ;;  %p2471_p5 = scmp.lt.s32.totalorder %s2465_s10, %s2465_s10 }
  0x85   :  { %p2472_p6 = por %p2471_p5, %p2470_p4 }
  0x87   :  { %p2473_p7 = pnand %p2472_p6, %p2466_p3 }
  0x89   :  { %2476 = shalt.err (!%p2473_p7)
}
  0x8a   :  { %s2567_s7 = smov 192   ;;  %s2568_s0 = smov 12  }
  0x8b   :  { %108 = dma.hbm_to_vmem [thread:$0]  %s3021_s9, 1536, %s2734_s18, [#allocation12], %s2567_s7, %s2567_s7, %s2568_s0  }
  0x8c   :  { %s2569_s17 = smov [#allocation16]   ;;  %s2570_s22 = smov [#allocation17]  }
  0x8d   :  { %s124_s20 = sshll.u32 %s2569_s17, 4  ;;  %s137_s23 = sshll.u32 %s2570_s22, 4  ;;  %s125_s20 = int_to_ptr.vmem [resolvable:$true] %s124_s20  ;;  %s138_s23 = int_to_ptr.vmem [resolvable:$true] %s137_s23 }
  0x8e   :  { %s2477_s5 = scalar_lea.hbm %s3023_s11, 9216 }
  0x8f   :  { %p2478_p8 = scmp.ne.s32.totalorder %s3023_s11, %s2477_s5  ;;  %p2481_p9 = scmp.lt.u32.totalorder %s2477_s5, %s3023_s11 }
  0x91   :  { %p2483_p10 = pnand %p2481_p9, %p2478_p8 }
  0x93   :  { %2486 = shalt.err (!%p2483_p10)
}
  0x94   :  { %s2487_s9 = scalar_lea.vmem %s125_s20, 9216  ;;  %p2492_p12 = scmp.lt.s32.totalorder %s125_s20, %s125_s20 }
  0x95   :  { %p2488_p11 = scmp.ne.s32.totalorder %s125_s20, %s2487_s9  ;;  %p2493_p13 = scmp.lt.s32.totalorder %s2487_s9, %s2487_s9 }
  0x97   :  { %p2494_p0 = por %p2493_p13, %p2492_p12 }
  0x99   :  { %p2495_p1 = pnand %p2494_p0, %p2488_p11 }
  0x9b   :  { %2498 = shalt.err (!%p2495_p1)
}
  0x9c   :  { %130 = dma.hbm_to_vmem [thread:$0]  %s3023_s11, 9216, %s125_s20, [#allocation15], %s2567_s7, %s2567_s7, %s2568_s0  }
  0x9d   :  { %s2499_s19 = scalar_lea.hbm %s3024_s12, 48 }
  0x9e   :  { %p2500_p2 = scmp.ne.s32.totalorder %s3024_s12, %s2499_s19  ;;  %p2503_p3 = scmp.lt.u32.totalorder %s2499_s19, %s3024_s12 }
  0xa0   :  { %p2505_p4 = pnand %p2503_p3, %p2500_p2 }
  0xa2   :  { %2508 = shalt.err (!%p2505_p4)
}
  0xa3   :  { %s2509_s17 = scalar_lea.vmem %s138_s23, 48  ;;  %s2513_s22 = scalar_lea.vmem %s138_s23, 64 }
  0xa4   :  { %p2510_p5 = scmp.ne.s32.totalorder %s138_s23, %s2509_s17  ;;  %p2514_p6 = scmp.lt.s32.totalorder %s138_s23, %s138_s23 }
  0xa5   :  { %p2515_p7 = scmp.lt.s32.totalorder %s2513_s22, %s2509_s17 }
  0xa7   :  { %p2516_p8 = por %p2515_p7, %p2514_p6 }
  0xa9   :  { %p2517_p9 = pnand %p2516_p8, %p2510_p5 }
  0xab   :  { %2520 = shalt.err (!%p2517_p9)
}
  0xac   :  { %140 = dma.hbm_to_vmem [thread:$0]  %s3024_s12, 48, %s138_s23, [#allocation18]  }
  0xad   :  { %2543 = dma.done.wait [#allocation3], 128  }
  0xae   :  { %2544 = vsyncadd [#allocation3], 4294967168 }
  0xaf   :  { %2545 = dma.done.wait [#allocation6], 272  }
  0xb0   :  { %2546 = vsyncadd [#allocation6], 4294967024 }
  0xb1   :  { %2547 = dma.done.wait [#allocation9], 528  }
  0xb2   :  { %2548 = vsyncadd [#allocation9], 4294966768 }
  0xb3   :  { %2549 = dma.done.wait [#allocation12], 1552  }
  0xb4   :  { %2550 = vsyncadd [#allocation12], 4294965744 }
  0xb5   :  { %2551 = dma.done.wait [#allocation15], 9264  }
  0xb6   :  { %2552 = vsyncadd [#allocation15], 4294958032 }
  0xb7   :  { %2553 = dma.done.wait [#allocation18], 48  }
  0xb8   :  { %2554 = vsyncadd [#allocation18], 4294967248  ;;  %v2571_v0 = vmov 0.0   ;;  %vm2572_vm0 = vmmov 0   ;;  %v2115_v1 = vld [vmem:[%s3013_s1] sm:$0xff]   ;;  %v2116_v2 = vld [vmem:[%s3013_s1 + $0x8] sm:$0xff]  }
  0xb9   :  { %1987 = vmatprep.subr.bf16.mxu0 %v2571_v0  ;;  %2003 = vmatprep.mubr.msk.bf16.mxu0 %vm2572_vm0, %v2571_v0  ;;  %v2117_v3 = vld [vmem:[%s3013_s1 + $0x10] sm:$0xff]   ;;  %v2118_v4 = vld [vmem:[%s3013_s1 + $0x18] sm:$0xff]   ;;  %v2119_v5 = vld [vmem:[%s3013_s1 + $0x20] sm:$0xff]   ;;  %vm330_vm1 = vcmask 523264   ;;  %vm399_vm2 = vcmask 261120   ;;  %v2573_v53 = vmov 0  }
  0xba   :  { %2007 = vmatprep.subr.bf16.mxu1 %v2571_v0  ;;  %2015 = vmatprep.mubr.msk.bf16.mxu1 %vm2572_vm0, %v2571_v0  ;;  %v2120_v6 = vld [vmem:[%s3013_s1 + $0x28] sm:$0xff]   ;;  %v2121_v7 = vld [vmem:[%s3013_s1 + $0x30] sm:$0xff]   ;;  %v2122_v8 = vld [vmem:[%s3013_s1 + $0x38] sm:$0xff]  }
  0xbb   :  { %1988 = vmatpush3.bf16.msra.mxu0 %v2115_v1  ;;  %v176_v9 = vld [vmem:[#allocation2] sm:$0xff]  ;;  %v2124_v12 = vld [vmem:[%s3015_s3 + $0x8] sm:$0xff]   ;;  %v2125_v13 = vld [vmem:[%s3015_s3 + $0x10] sm:$0xff]  }
  0xbc   :  { %1989 = vmatprep.subr.bf16.mxu0 %v2571_v0  ;;  %v193_v10 = vpack.c.bf16 %v176_v9, %v176_v9  ;;  %v2123_v11 = vld [vmem:[%s3015_s3] sm:$0xff]   ;;  %v2126_v14 = vld [vmem:[%s3015_s3 + $0x18] sm:$0xff]   ;;  %v2127_v23 = vld [vmem:[#allocation7] sm:$0xff]  }
  0xbd   :  { %2008 = vmatpush3.bf16.msra.mxu1 %v2123_v11  ;;  %v1761_v15 = vld [vmem:[%s3014_s2] ss:$0 sm:$0xff]  ;;  %v2128_v24 = vld [vmem:[#allocation7 + $0x8] sm:$0xff]   ;;  %v1770_v25 = vld [vmem:[#allocation5] ss:$0 sm:$0xff] }
  0xbe   :  { %2009 = vmatprep.subr.bf16.mxu1 %v2571_v0  ;;  %v2129_v33 = vld [vmem:[#allocation10] sm:$0xff]   ;;  %v2130_v34 = vld [vmem:[#allocation10 + $0x8] sm:$0xff]   ;;  %v2131_v35 = vld [vmem:[#allocation10 + $0x10] sm:$0xff]  }
  0xbf   :  { %1990 = vmatpush3.bf16.msra.mxu0 %v2116_v2  ;;  %v2132_v36 = vld [vmem:[#allocation10 + $0x18] sm:$0xff]   ;;  %v2135_v37 = vld [vmem:[#allocation13 + $0x4] ss:$12 sps:$4 sm:$0xff]   ;;  %v2133_v45 = vld [vmem:[#allocation13] ss:$12 sps:$4 sm:$0xff]  }
  0xc0   :  { %1991 = vmatprep.subr.bf16.mxu0 %v2571_v0  ;;  %v1776_v38 = vld [vmem:[#allocation8] ss:$0 sm:$0xff]  ;;  %v2136_v48 = vld [vmem:[#allocation13 + $0x18] ss:$12 sps:$4 sm:$0xff]   ;;  %v2141_v49 = vld [vmem:[#allocation13 + $0x34] ss:$12 sps:$4 sm:$0xff]  }
  0xc1   :  { %2010 = vmatpush3.bf16.msra.mxu1 %v2124_v12  ;;  %v2138_v47 = vld [vmem:[#allocation13 + $0x1c] ss:$12 sps:$4 sm:$0xff]   ;;  %v2144_v51 = vld [vmem:[#allocation13 + $0x4c] ss:$12 sps:$4 sm:$0xff]   ;;  %v2149_v54 = vld [vmem:[#allocation16] ss:$12 sps:$4 sm:$0xff]  }
  0xc2   :  { %2011 = vmatprep.subr.bf16.mxu1 %v2571_v0  ;;  %v2139_v50 = vld [vmem:[#allocation13 + $0x30] ss:$12 sps:$4 sm:$0xff]   ;;  %v2142_v52 = vld [vmem:[#allocation13 + $0x48] ss:$12 sps:$4 sm:$0xff]   ;;  %v2154_v56 = vld [vmem:[#allocation16 + $0x1c] ss:$12 sps:$4 sm:$0xff]  }
  0xc3   :  { %1992 = vmatpush3.bf16.msra.mxu0 %v2117_v3  ;;  %v2151_v55 = vld [vmem:[#allocation16 + $0x4] ss:$12 sps:$4 sm:$0xff]   ;;  %v2157_v58 = vld [vmem:[#allocation16 + $0x34] ss:$12 sps:$4 sm:$0xff]   ;;  %v2160_v60 = vld [vmem:[#allocation16 + $0x4c] ss:$12 sps:$4 sm:$0xff]  }
  0xc4   :  { %1993 = vmatprep.subr.bf16.mxu0 %v2571_v0  ;;  %v2152_v57 = vld [vmem:[#allocation16 + $0x18] ss:$12 sps:$4 sm:$0xff]   ;;  %v2155_v59 = vld [vmem:[#allocation16 + $0x30] ss:$12 sps:$4 sm:$0xff]   ;;  %v2158_v61 = vld [vmem:[#allocation16 + $0x48] ss:$12 sps:$4 sm:$0xff]  }
  0xc5   :  { %2012 = vmatpush3.bf16.msra.mxu1 %v2125_v13  ;;  %v2163_v62 = vld [vmem:[#allocation16 + $0x64] ss:$12 sps:$4 sm:$0xff]   ;;  %v2161_v63 = vld [vmem:[#allocation16 + $0x60] ss:$12 sps:$4 sm:$0xff]   ;;  %v2166_v1 = vld [vmem:[#allocation16 + $0x7c] ss:$12 sps:$4 sm:$0xff]  }
  0xc6   :  { %2013 = vmatprep.subr.bf16.mxu1 %v2571_v0  ;;  %v2164_v2 = vld [vmem:[#allocation16 + $0x78] ss:$12 sps:$4 sm:$0xff]   ;;  %v2169_v3 = vld [vmem:[#allocation16 + $0x94] ss:$12 sps:$4 sm:$0xff]   ;;  %v2180_v9 = vld [vmem:[#allocation16 + $0xdc] ss:$12 sps:$4 sm:$0xff]  }
  0xc7   :  { %1994 = vmatpush3.bf16.msra.mxu0 %v2118_v4  ;;  %v2167_v4 = vld [vmem:[#allocation16 + $0x90] ss:$12 sps:$4 sm:$0xff]   ;;  %v2185_v11 = vld [vmem:[#allocation16 + $0xf4] ss:$12 sps:$4 sm:$0xff]   ;;  %v2190_v13 = vld [vmem:[#allocation16 + $0x10c] ss:$12 sps:$4 sm:$0xff]  }
  0xc8   :  { %1995 = vmatprep.subr.bf16.mxu0 %v2571_v0  ;;  %v2183_v12 = vld [vmem:[#allocation16 + $0xf0] ss:$12 sps:$4 sm:$0xff]  }
  0xc9   :  { %2014 = vmatpush3.bf16.msra.mxu1 %v2126_v14  ;;  %v2188_v14 = vld [vmem:[#allocation16 + $0x108] ss:$12 sps:$4 sm:$0xff]  }
  0xca   :  { %2019 = vmatprep.subr.bf16.mxu1 %v2571_v0 }
  0xcb   :  { %1996 = vmatpush3.bf16.msra.mxu0 %v2119_v5  ;;  %v2172_v5 = vld [vmem:[#allocation16 + $0xac] ss:$12 sps:$4 sm:$0xff]  }
  0xcc   :  { %1997 = vmatprep.subr.bf16.mxu0 %v2571_v0 }
  0xcf   :  { %1998 = vmatpush3.bf16.msra.mxu0 %v2120_v6  ;;  %v2170_v6 = vld [vmem:[#allocation16 + $0xa8] ss:$12 sps:$4 sm:$0xff]  }
  0xd0   :  { %1999 = vmatprep.subr.bf16.mxu0 %v2571_v0 }
  0xd3   :  { %2000 = vmatpush3.bf16.msra.mxu0 %v2121_v7  ;;  %v2175_v7 = vld [vmem:[#allocation16 + $0xc4] ss:$12 sps:$4 sm:$0xff]  }
  0xd4   :  { %2001 = vmatprep.subr.bf16.mxu0 %v2571_v0 }
  0xd7   :  { %2002 = vmatpush3.bf16.msra.mxu0 %v2122_v8  ;;  %v2173_v8 = vld [vmem:[#allocation16 + $0xc0] ss:$12 sps:$4 sm:$0xff]  }
  0xd8   :  { %1213 = vmatprep.subr.bf16.mxu0 %v2151_v55 }
  0xda   :  { %2004 = vmatmul.mubr.bf16.vlgmr.msra.gmra.mrb[0].mxu0 %v193_v10  ;;  %v2178_v10 = vld [vmem:[#allocation16 + $0xd8] ss:$12 sps:$4 sm:$0xff]  }
  0xdb   :  { %1214 = vmatpush1.bf16.msra.mxu0 %v2149_v54 }
  0xdc   :  { %1215 = vmatprep.subr.bf16.mxu0 %v2154_v56  ;;  %v545_v56 = vld [vmem:[#allocation14] sm:$0x7] }
  0xdf   :  { %1216 = vmatpush1.bf16.msra.mxu0 %v2152_v57 }
  0xe0   :  { %1217 = vmatprep.subr.bf16.mxu0 %v2157_v58 }
  0xe3   :  { %1218 = vmatpush1.bf16.msra.mxu0 %v2155_v59 }
  0xe4   :  { %1219 = vmatprep.subr.bf16.mxu0 %v2160_v60 }
  0xe7   :  { %1220 = vmatpush1.bf16.msra.mxu0 %v2158_v61 }
  0xe8   :  { %1221 = vmatprep.subr.bf16.mxu0 %v2163_v62 }
  0xeb   :  { %1222 = vmatpush1.bf16.msra.mxu0 %v2161_v63 }
  0xec   :  { %1223 = vmatprep.subr.bf16.mxu0 %v2166_v1 }
  0xef   :  { %1224 = vmatpush1.bf16.msra.mxu0 %v2164_v2 }
  0xf0   :  { %1225 = vmatprep.subr.bf16.mxu0 %v2169_v3 }
  0xf3   :  { %1226 = vmatpush1.bf16.msra.mxu0 %v2167_v4 }
  0xf4   :  { %1227 = vmatprep.subr.bf16.mxu0 %v2172_v5 }
  0xf7   :  { %1228 = vmatpush1.bf16.msra.mxu0 %v2170_v6  ;;  %v2213_v6 = vld [vmem:[#allocation16 + $0x180] ss:$12 sps:$4 sm:$0xff]  }
  0xf8   :  { %1229 = vmatprep.subr.bf16.mxu0 %v2175_v7  ;;  %v2216_v7 = vld [vmem:[#allocation16 + $0x188] ss:$12 sps:$4 sm:$0xff]  }
  0xfb   :  { %1230 = vmatpush1.bf16.msra.mxu0 %v2173_v8 }
  0xfc   :  { %1231 = vmatprep.subr.bf16.mxu0 %v2180_v9 }
  0xff   :  { %1232 = vmatpush1.bf16.msra.mxu0 %v2178_v10  ;;  %v2219_v10 = vld [vmem:[#allocation16 + $0x19c] ss:$12 sps:$4 sm:$0xff]  }
 0x100   :  { %1233 = vmatprep.subr.bf16.mxu0 %v2185_v11 }
 0x103   :  { %1234 = vmatpush1.bf16.msra.mxu0 %v2183_v12 }
 0x104   :  { %1235 = vmatprep.subr.bf16.mxu0 %v2190_v13 }
 0x107   :  { %1236 = vmatpush1.bf16.msra.mxu0 %v2188_v14  ;;  %v2217_v14 = vld [vmem:[#allocation16 + $0x198] ss:$12 sps:$4 sm:$0xff]  }
 0x1ad   :  { %v283_v16 = vpop.f32.mrb[0].mxu0 }
 0x1ae   :  { %v284_v17 = vadd.f32 %v1761_v15, %v283_v16  ;;  %v2005_v18 = vpop.f32.mrb[1].mxu0  ;;  %v1780_v15 = vld [vmem:[#allocation11] ss:$0 sm:$0xff] }
 0x1af   :  { %v286_v19 = vpop.f32.mrb[2].mxu0 }
 0x1b0   :  { %2269 = vtanh.f32 %v284_v17  ;;  %v2006_v20 = vpop.f32.mrb[3].mxu0 }
 0x1ba   :  { %v2270_v21 = vpop.eup %2269 }
 0x1bb   :  { %v298_v22 = vpack.c.bf16 %v2270_v21, %v2270_v21 }
 0x1bd   :  { %2016 = vmatmul.mubr.msk.bf16.vlgmr.msra.gmra.mrb[0].mxu1 %vm330_vm1, %v298_v22  ;;  %v2145_v22 = vld [vmem:[#allocation13 + $0x8] ss:$12 sps:$4 sm:$0xff]  }
 0x1be   :  { %2023 = vmatprep.mubr.msk.bf16.mxu1 %vm2572_vm0, %v2571_v0  ;;  %2020 = vmatpush3.bf16.msra.mxu1 %v2127_v23 }
 0x1bf   :  { %2021 = vmatprep.subr.bf16.mxu1 %v2571_v0 }
 0x1c2   :  { %2022 = vmatpush3.bf16.msra.mxu1 %v2128_v24  ;;  %v2146_v24 = vld [vmem:[#allocation13 + $0x20] ss:$12 sps:$4 sm:$0xff]  }
 0x1c3   :  { %2027 = vmatprep.subr.bf16.mxu1 %v2571_v0 }
 0x290   :  { %v368_v26 = vpop.f32.mrb[0].mxu1 }
 0x291   :  { %v369_v27 = vadd.f32 %v1770_v25, %v368_v26  ;;  %v2017_v28 = vpop.f32.mrb[1].mxu1  ;;  %v2147_v25 = vld [vmem:[#allocation13 + $0x38] ss:$12 sps:$4 sm:$0xff]   ;;  %v2148_v26 = vld [vmem:[#allocation13 + $0x50] ss:$12 sps:$4 sm:$0xff]  }
 0x292   :  { %v371_v29 = vpop.f32.mrb[2].mxu1  ;;  %v2177_v28 = vld [vmem:[#allocation16 + $0x8] ss:$12 sps:$4 sm:$0xff]  }
 0x293   :  { %2271 = vtanh.f32 %v369_v27  ;;  %v2018_v30 = vpop.f32.mrb[3].mxu1  ;;  %v2176_v27 = vld [vmem:[#allocation16 + $0xc8] ss:$12 sps:$4 sm:$0xff]   ;;  %v2181_v29 = vld [vmem:[#allocation16 + $0xe0] ss:$12 sps:$4 sm:$0xff]  }
 0x294   :  { %v2182_v30 = vld [vmem:[#allocation16 + $0x20] ss:$12 sps:$4 sm:$0xff]  }
 0x29d   :  { %v2272_v31 = vpop.eup %2271 }
 0x29e   :  { %v379_v32 = vpack.c.bf16 %v2272_v31, %v2272_v31  ;;  %v2186_v31 = vld [vmem:[#allocation16 + $0xf8] ss:$12 sps:$4 sm:$0xff]  }
 0x2a0   :  { %2024 = vmatmul.mubr.msk.bf16.vlgmr.msra.gmra.mrb[4].mxu1 %vm399_vm2, %v379_v32  ;;  %v2187_v32 = vld [vmem:[#allocation16 + $0x38] ss:$12 sps:$4 sm:$0xff]  }
 0x2a1   :  { %2035 = vmatprep.mubr.msk.bf16.mxu1 %vm2572_vm0, %v2571_v0  ;;  %2028 = vmatpush3.bf16.msra.mxu1 %v2129_v33  ;;  %v2191_v33 = vld [vmem:[#allocation16 + $0x110] ss:$12 sps:$4 sm:$0xff]  }
 0x2a2   :  { %2029 = vmatprep.subr.bf16.mxu1 %v2571_v0 }
 0x2a5   :  { %2030 = vmatpush3.bf16.msra.mxu1 %v2130_v34  ;;  %v2192_v34 = vld [vmem:[#allocation16 + $0x50] ss:$12 sps:$4 sm:$0xff]  }
 0x2a6   :  { %2031 = vmatprep.subr.bf16.mxu1 %v2571_v0 }
 0x2a9   :  { %2032 = vmatpush3.bf16.msra.mxu1 %v2131_v35  ;;  %v2195_v35 = vld [vmem:[#allocation16 + $0x124] ss:$12 sps:$4 sm:$0xff]  }
 0x2aa   :  { %2033 = vmatprep.subr.bf16.mxu1 %v2571_v0  ;;  %1237 = vmatprep.subr.bf16.mxu0 %v2195_v35  ;;  %v2244_v35 = vld [vmem:[#allocation16 + $0x230] ss:$12 sps:$4 sm:$0xff]  }
 0x2ad   :  { %2034 = vmatpush3.bf16.msra.mxu1 %v2132_v36  ;;  %v2196_v36 = vld [vmem:[#allocation16 + $0x128] ss:$12 sps:$4 sm:$0xff]  }
 0x2ae   :  { %629 = vmatprep.subr.bf16.mxu1 %v2135_v37  ;;  %v2193_v37 = vld [vmem:[#allocation16 + $0x120] ss:$12 sps:$4 sm:$0xff]  }
 0x2af   :  { %1238 = vmatpush1.bf16.msra.mxu0 %v2193_v37 }
 0x373   :  { %v437_v39 = vpop.f32.mrb[4].mxu1 }
 0x374   :  { %v438_v40 = vadd.f32 %v1776_v38, %v437_v39  ;;  %v2025_v41 = vpop.f32.mrb[5].mxu1  ;;  %v2197_v38 = vld [vmem:[#allocation16 + $0x68] ss:$12 sps:$4 sm:$0xff]  }
 0x375   :  { %v440_v42 = vpop.f32.mrb[6].mxu1  ;;  %v2200_v39 = vld [vmem:[#allocation16 + $0x13c] ss:$12 sps:$4 sm:$0xff]   ;;  %v2198_v41 = vld [vmem:[#allocation16 + $0x138] ss:$12 sps:$4 sm:$0xff]  }
 0x376   :  { %2273 = vtanh.f32 %v438_v40  ;;  %v2026_v43 = vpop.f32.mrb[7].mxu1  ;;  %v2201_v40 = vld [vmem:[#allocation16 + $0x140] ss:$12 sps:$4 sm:$0xff]   ;;  %1239 = vmatprep.subr.bf16.mxu0 %v2200_v39 }
 0x377   :  { %v2202_v42 = vld [vmem:[#allocation16 + $0x80] ss:$12 sps:$4 sm:$0xff]   ;;  %1240 = vmatpush1.bf16.msra.mxu0 %v2198_v41 }
 0x378   :  { %v2205_v43 = vld [vmem:[#allocation16 + $0x154] ss:$12 sps:$4 sm:$0xff]   ;;  %v2249_v41 = vld [vmem:[%s3025_s13 + $0x48] sm:$0xff]  }
 0x379   :  { %1241 = vmatprep.subr.bf16.mxu0 %v2205_v43  ;;  %v2246_v39 = vld [vmem:[%s3025_s13 + $0x40] sm:$0xff]   ;;  %v2250_v43 = vld [vmem:[%s3025_s13 + $0x8] sm:$0xff]  }
 0x380   :  { %v2274_v44 = vpop.eup %2273 }
 0x381   :  { %v452_v46 = vpack.c.bf16 %v2274_v44, %v2274_v44  ;;  %v2206_v44 = vld [vmem:[#allocation16 + $0x158] ss:$12 sps:$4 sm:$0xff]  }
 0x383   :  { %2036 = vmatmul.mubr.msk.bf16.vlgmr.msra.gmra.mrb[8].mxu1 %vm330_vm1, %v452_v46  ;;  %v2207_v46 = vld [vmem:[#allocation16 + $0x98] ss:$12 sps:$4 sm:$0xff]  }
 0x384   :  { %630 = vmatpush1.bf16.msra.mxu1 %v2133_v45  ;;  %661 = vmatprep.mubr.bf16.mxu1 %v2573_v53  ;;  %v2203_v45 = vld [vmem:[#allocation16 + $0x150] ss:$12 sps:$4 sm:$0xff]  }
 0x385   :  { %631 = vmatprep.subr.bf16.mxu1 %v2138_v47  ;;  %1242 = vmatpush1.bf16.msra.mxu0 %v2203_v45  ;;  %v2210_v47 = vld [vmem:[#allocation16 + $0x16c] ss:$12 sps:$4 sm:$0xff]  }
 0x386   :  { %1243 = vmatprep.subr.bf16.mxu0 %v2210_v47  ;;  %v2251_v45 = vld [vmem:[%s3025_s13 + $0x90] sm:$0xff]   ;;  %v2255_v47 = vld [vmem:[%s3025_s13 + $0x58] sm:$0xff]  }
 0x388   :  { %632 = vmatpush1.bf16.msra.mxu1 %v2136_v48  ;;  %v2211_v48 = vld [vmem:[#allocation16 + $0x170] ss:$12 sps:$4 sm:$0xff]  }
 0x389   :  { %633 = vmatprep.subr.bf16.mxu1 %v2141_v49  ;;  %v2208_v49 = vld [vmem:[#allocation16 + $0x168] ss:$12 sps:$4 sm:$0xff]  }
 0x38a   :  { %1244 = vmatpush1.bf16.msra.mxu0 %v2208_v49  ;;  %v2256_v49 = vld [vmem:[%s3025_s13 + $0x18] sm:$0xff]  }
 0x38c   :  { %634 = vmatpush1.bf16.msra.mxu1 %v2139_v50  ;;  %v2212_v50 = vld [vmem:[#allocation16 + $0xb0] ss:$12 sps:$4 sm:$0xff]  }
 0x38d   :  { %635 = vmatprep.subr.bf16.mxu1 %v2144_v51  ;;  %v2215_v51 = vld [vmem:[#allocation16 + $0x184] ss:$12 sps:$4 sm:$0xff]  }
 0x38e   :  { %1254 = vmatprep.subr.bf16.mxu0 %v2215_v51  ;;  %v2258_v51 = vld [vmem:[%s3025_s13 + $0x60] sm:$0xff]  }
 0x390   :  { %636 = vmatpush1.bf16.msra.mxu1 %v2142_v52  ;;  %v547_v52 = vlaneseq }
 0x391   :  { %2039 = vmatprep.subr.bf16.mxu1 %v2571_v0 }
 0x392   :  { %v2867_v54 = vshrl.u32 %v547_v52, 7 }
 0x394   :  { %v549_v55 = vsub.s32 0, %v2867_v54  ;;  %v553_v57 = vsub.s32 1, %v2867_v54 }
 0x396   :  { %v550_v58 = vrot.slane %v545_v56, %v549_v55  ;;  %v554_v59 = vrot.slane %v545_v56, %v553_v57 }
 0x456   :  { %v521_v16 = vpop.f32.mrb[8].mxu1 }
 0x457   :  { %v522_v17 = vadd.f32 %v1780_v15, %v521_v16  ;;  %v2037_v18 = vpop.f32.mrb[9].mxu1  ;;  %v2220_v15 = vld [vmem:[#allocation16 + $0x1a0] ss:$12 sps:$4 sm:$0xff]  }
 0x458   :  { %v524_v19 = vpop.f32.mrb[10].mxu1  ;;  %v2223_v16 = vld [vmem:[#allocation16 + $0x1b4] ss:$12 sps:$4 sm:$0xff]   ;;  %v2221_v18 = vld [vmem:[#allocation16 + $0x1b0] ss:$12 sps:$4 sm:$0xff]  }
 0x459   :  { %2275 = vtanh.f32 %v522_v17  ;;  %v2038_v20 = vpop.f32.mrb[11].mxu1  ;;  %v557_v17 = vsub.s32 2, %v2867_v54  ;;  %v2224_v19 = vld [vmem:[#allocation16 + $0x1b8] ss:$12 sps:$4 sm:$0xff]  }
 0x45a   :  { %v2227_v20 = vld [vmem:[#allocation16 + $0x1cc] ss:$12 sps:$4 sm:$0xff]  }
 0x463   :  { %v2276_v21 = vpop.eup %2275 }
 0x464   :  { %v544_v23 = vpack.c.bf16 %v2276_v21, %v2276_v21  ;;  %v558_v21 = vrot.slane %v545_v56, %v557_v17  ;;  %v2259_v56 = vld [vmem:[%s3025_s13 + $0x20] sm:$0xff]  }
 0x466   :  { %1798 = vmatmul.mubr.msk.bf16.vlgmr.msra.gmra.mrb[12].mxu1 %vm330_vm1, %v544_v23 }
 0x467   :  { %2040 = vmatpush3.bf16.msra.mxu1 %v2145_v22  ;;  %2047 = vmatprep.mubr.msk.bf16.mxu1 %vm2572_vm0, %v2571_v0  ;;  %v2225_v22 = vld [vmem:[#allocation16 + $0x1c8] ss:$12 sps:$4 sm:$0xff]  }
 0x468   :  { %2041 = vmatprep.subr.bf16.mxu1 %v2571_v0 }
 0x46b   :  { %2042 = vmatpush3.bf16.msra.mxu1 %v2146_v24 }
 0x46c   :  { %2043 = vmatprep.subr.bf16.mxu1 %v2571_v0 }
 0x46f   :  { %2044 = vmatpush3.bf16.msra.mxu1 %v2147_v25  ;;  %v2229_v25 = vld [vmem:[#allocation16 + $0x1e0] ss:$12 sps:$4 sm:$0xff]  }
 0x470   :  { %2045 = vmatprep.subr.bf16.mxu1 %v2571_v0 }
 0x473   :  { %2046 = vmatpush3.bf16.msra.mxu1 %v2148_v26  ;;  %v2232_v26 = vld [vmem:[#allocation16 + $0x1e8] ss:$12 sps:$4 sm:$0xff]  }
 0x474   :  { %1925 = vmatprep.subr.bf16.mxu1 %v2176_v27  ;;  %v2235_v27 = vld [vmem:[#allocation16 + $0x1fc] ss:$12 sps:$4 sm:$0xff]  }
 0x476   :  { %2048 = vmatmul.mubr.msk.bf16.vlgmr.msra.gmra.mrb[16].mxu1 %vm330_vm1, %v544_v23  ;;  %v2231_v23 = vld [vmem:[#allocation16 + $0x1e4] ss:$12 sps:$4 sm:$0xff]  }
 0x477   :  { %1926 = vmatpush3.bf16.msra.mxu1 %v2177_v28  ;;  %v2233_v28 = vld [vmem:[#allocation16 + $0x1f8] ss:$12 sps:$4 sm:$0xff]  }
 0x478   :  { %1927 = vmatprep.subr.bf16.mxu1 %v2181_v29  ;;  %v2236_v29 = vld [vmem:[#allocation16 + $0x200] ss:$12 sps:$4 sm:$0xff]  }
 0x47b   :  { %1928 = vmatpush3.bf16.msra.mxu1 %v2182_v30  ;;  %v2239_v30 = vld [vmem:[#allocation16 + $0x214] ss:$12 sps:$4 sm:$0xff]  }
 0x47c   :  { %1929 = vmatprep.subr.bf16.mxu1 %v2186_v31  ;;  %v2237_v31 = vld [vmem:[#allocation16 + $0x210] ss:$12 sps:$4 sm:$0xff]  }
 0x47f   :  { %1930 = vmatpush3.bf16.msra.mxu1 %v2187_v32  ;;  %v2240_v32 = vld [vmem:[#allocation16 + $0x218] ss:$12 sps:$4 sm:$0xff]  }
 0x480   :  { %1931 = vmatprep.subr.bf16.mxu1 %v2191_v33  ;;  %v2243_v33 = vld [vmem:[#allocation16 + $0x22c] ss:$12 sps:$4 sm:$0xff]  }
 0x483   :  { %1932 = vmatpush3.bf16.msra.mxu1 %v2192_v34  ;;  %v2241_v34 = vld [vmem:[#allocation16 + $0x228] ss:$12 sps:$4 sm:$0xff]  }
 0x484   :  { %1933 = vmatprep.subr.bf16.mxu1 %v2196_v36 }
 0x487   :  { %1934 = vmatpush3.bf16.msra.mxu1 %v2197_v38  ;;  %v2245_v38 = vld [vmem:[%s3025_s13 + $0x80] sm:$0xff]  }
 0x488   :  { %1935 = vmatprep.subr.bf16.mxu1 %v2201_v40  ;;  %v2247_v40 = vld [vmem:[%s3025_s13] sm:$0xff]  }
 0x48b   :  { %1936 = vmatpush3.bf16.msra.mxu1 %v2202_v42  ;;  %v2248_v42 = vld [vmem:[%s3025_s13 + $0x88] sm:$0xff]  }
 0x48c   :  { %1937 = vmatprep.subr.bf16.mxu1 %v2206_v44  ;;  %v2252_v44 = vld [vmem:[%s3025_s13 + $0x50] sm:$0xff]  }
 0x48f   :  { %1938 = vmatpush3.bf16.msra.mxu1 %v2207_v46  ;;  %v2253_v46 = vld [vmem:[%s3025_s13 + $0x10] sm:$0xff]  }
 0x490   :  { %1939 = vmatprep.subr.bf16.mxu1 %v2211_v48  ;;  %v2254_v48 = vld [vmem:[%s3025_s13 + $0x98] sm:$0xff]  }
 0x493   :  { %1940 = vmatpush3.bf16.msra.mxu1 %v2212_v50  ;;  %v2257_v50 = vld [vmem:[%s3025_s13 + $0xa0] sm:$0xff]  }
 0x494   :  { %2051 = vmatprep.subr.bf16.mxu1 %v2571_v0 }
 0x539   :  { %v663_v60 = vpop.f32.mrb[12].mxu1 }
 0x53a   :  { %v664_v61 = vadd.f32 %v663_v60, %v550_v58  ;;  %v665_v62 = vpop.f32.mrb[13].mxu1  ;;  %v2260_v58 = vld [vmem:[%s3025_s13 + $0xa8] sm:$0xff]  }
 0x53b   :  { %v666_v63 = vadd.f32 %v665_v62, %v554_v59  ;;  %v667_v1 = vpop.f32.mrb[14].mxu1  ;;  %v2261_v59 = vld [vmem:[%s3025_s13 + $0x68] sm:$0xff]   ;;  %v2264_v62 = vld [vmem:[%s3025_s13 + $0x70] sm:$0xff]  }
 0x53c   :  { %2277 = vtanh.f32 %v664_v61  ;;  %v668_v2 = vpop.f32.mrb[15].mxu1  ;;  %v2262_v60 = vld [vmem:[%s3025_s13 + $0x28] sm:$0xff]   ;;  %v2263_v61 = vld [vmem:[%s3025_s13 + $0xb0] sm:$0xff]   ;;  %v2266_v1 = vld [vmem:[%s3025_s13 + $0xb8] sm:$0xff]  }
 0x53d   :  { %2279 = vtanh.f32 %v666_v63  ;;  %v2265_v63 = vld [vmem:[%s3025_s13 + $0x30] sm:$0xff]   ;;  %v2267_v2 = vld [vmem:[%s3025_s13 + $0x78] sm:$0xff]  }
 0x546   :  { %v2278_v3 = vpop.eup %2277 }
 0x547   :  { %v2280_v4 = vpop.eup %2279  ;;  %v809_v8 = vpack.c.bf16 %v2278_v3, %v2278_v3  ;;  %v2268_v3 = vld [vmem:[%s3025_s13 + $0x38] sm:$0xff]  }
 0x548   :  { %v810_v5 = vpack.c.bf16 %v2280_v4, %v2280_v4 }
 0x549   :  { %v704_v9 = vpop.f32.mrb[16].mxu1 }
 0x54a   :  { %v2049_v11 = vpop.f32.mrb[17].mxu1  ;;  %1245 = vmatprep.mubr.bf16.mxu0 %v810_v5  ;;  %1327 = vmatprep.mubr.bf16.mxu1 %v810_v5  ;;  %v705_v24 = vadd.f32 %v704_v9, %v558_v21 }
 0x54b   :  { %v707_v12 = vpop.f32.mrb[18].mxu1  ;;  %1246 = vmatmul.mubr.bf16.vlgmr.msra.gmra.mrb[4].mxu0 %v809_v8  ;;  %1328 = vmatmul.mubr.bf16.vlgmr.msra.gmra.mrb[20].mxu1 %v809_v8  ;;  %v812_v8 = vld [vmem:[#allocation17] sm:$0x7] }
 0x54c   :  { %v2050_v13 = vpop.f32.mrb[19].mxu1  ;;  %1255 = vmatpush1.bf16.msra.mxu0 %v2213_v6  ;;  %2052 = vmatpush3.bf16.msra.mxu1 %v2216_v7  ;;  %2281 = vtanh.f32 %v705_v24  ;;  %v825_v9 = vrot.slane %v812_v8, %v557_v17  ;;  %v821_v11 = vrot.slane %v812_v8, %v553_v57 }
 0x54d   :  { %1256 = vmatprep.subr.bf16.mxu0 %v2219_v10  ;;  %2053 = vmatprep.subr.bf16.mxu1 %v2571_v0  ;;  %v817_v10 = vrot.slane %v812_v8, %v549_v55 }
 0x54e   :  { %1286 = vmatprep.mubr.bf16.mxu0 %v2573_v53  ;;  %2067 = vmatprep.mubr.msk.bf16.mxu1 %vm2572_vm0, %v2571_v0  ;;  %v2228_v53 = vld [vmem:[#allocation16 + $0x1d0] ss:$12 sps:$4 sm:$0xff]  }
 0x550   :  { %1257 = vmatpush1.bf16.msra.mxu0 %v2217_v14  ;;  %2054 = vmatpush3.bf16.msra.mxu1 %v2220_v15 }
 0x551   :  { %1258 = vmatprep.subr.bf16.mxu0 %v2223_v16  ;;  %2055 = vmatprep.subr.bf16.mxu1 %v2571_v0 }
 0x554   :  { %1259 = vmatpush1.bf16.msra.mxu0 %v2221_v18  ;;  %2056 = vmatpush3.bf16.msra.mxu1 %v2224_v19 }
 0x555   :  { %1260 = vmatprep.subr.bf16.mxu0 %v2227_v20  ;;  %2057 = vmatprep.subr.bf16.mxu1 %v2571_v0 }
 0x556   :  { %v2282_v36 = vpop.eup %2281 }
 0x557   :  { %v811_v37 = vpack.c.bf16 %v2282_v36, %v2282_v36 }
 0x558   :  { %1261 = vmatpush1.bf16.msra.mxu0 %v2225_v22  ;;  %2058 = vmatpush3.bf16.msra.mxu1 %v2228_v53 }
 0x559   :  { %1262 = vmatprep.subr.bf16.mxu0 %v2231_v23  ;;  %2059 = vmatprep.subr.bf16.mxu1 %v2571_v0 }
 0x55c   :  { %1263 = vmatpush1.bf16.msra.mxu0 %v2229_v25  ;;  %2060 = vmatpush3.bf16.msra.mxu1 %v2232_v26  ;;  %v2977_v26 = vand.u32 127, %v547_v52 }
 0x55d   :  { %1264 = vmatprep.subr.bf16.mxu0 %v2235_v27  ;;  %2061 = vmatprep.subr.bf16.mxu1 %v2571_v0 }
 0x55e   :  { %vm1694_vm3 = vcmp.ge.s32.totalorder %v2977_v26, 16  ;;  %vm1695_vm4 = vcmp.lt.s32.totalorder %v2977_v26, 28  ;;  %vm1663_vm6 = vcmp.lt.s32.totalorder %v2977_v26, 16  ;;  %vm1732_vm11 = vcmp.eq.s32.totalorder %v2977_v26, 33 }
 0x55f   :  { %vm1696_vm5 = vmand %vm1694_vm3, %vm1695_vm4  ;;  %vm1731_vm12 = vcmp.eq.s32.totalorder %v2977_v26, 32  ;;  %vm1730_vm13 = vcmp.eq.s32.totalorder %v2977_v26, 31  ;;  %vm1729_vm14 = vcmp.eq.s32.totalorder %v2977_v26, 30 }
 0x560   :  { %1265 = vmatpush1.bf16.msra.mxu0 %v2233_v28  ;;  %2062 = vmatpush3.bf16.msra.mxu1 %v2236_v29 }
 0x561   :  { %1266 = vmatprep.subr.bf16.mxu0 %v2239_v30  ;;  %2063 = vmatprep.subr.bf16.mxu1 %v2571_v0 }
 0x564   :  { %1267 = vmatpush1.bf16.msra.mxu0 %v2237_v31  ;;  %2064 = vmatpush3.bf16.msra.mxu1 %v2240_v32  ;;  %v1872_v31 = vld [vmem:[%s3026_s14] ss:$0 sm:$0xff]  ;;  %s2574_s14 = smov [#allocation19]  }
 0x565   :  { %1268 = vmatprep.subr.bf16.mxu0 %v2243_v33  ;;  %2065 = vmatprep.subr.bf16.mxu1 %v2571_v0  ;;  %s1747_s26 = sshll.u32 %s2574_s14, 4  ;;  %s1748_s26 = int_to_ptr.vmem [resolvable:$true] %s1747_s26 }
 0x566   :  { %s2521_s1 = scalar_lea.vmem %s1748_s26, 128  ;;  %p2526_p11 = scmp.lt.s32.totalorder %s1748_s26, %s1748_s26 }
 0x567   :  { %p2522_p10 = scmp.ne.s32.totalorder %s1748_s26, %s2521_s1  ;;  %p2527_p12 = scmp.lt.s32.totalorder %s2521_s1, %s2521_s1 }
 0x568   :  { %1269 = vmatpush1.bf16.msra.mxu0 %v2241_v34  ;;  %2066 = vmatpush3.bf16.msra.mxu1 %v2244_v35 }
 0x569   :  { %2071 = vmatprep.subr.bf16.mxu0 %v2571_v0  ;;  %1956 = vmatprep.subr.bf16.mxu1 %v2246_v39  ;;  %p2528_p13 = por %p2527_p12, %p2526_p11 }
 0x56b   :  { %1287 = vmatmul.mubr.bf16.vlgmr.msra.gmra.mrb[4].mxu0 %v811_v37  ;;  %2068 = vmatmul.mubr.bf16.vlgmr.msra.gmra.mrb[24].mxu1 %v811_v37  ;;  %p2529_p0 = pnand %p2528_p13, %p2522_p10 }
 0x56c   :  { %2087 = vmatprep.mubr.msk.bf16.mxu0 %vm2572_vm0, %v2571_v0  ;;  %2072 = vmatpush3.bf16.msra.mxu0 %v2245_v38 }
 0x56d   :  { %1957 = vmatpush3.bf16.msra.mxu1 %v2247_v40  ;;  %2073 = vmatprep.subr.bf16.mxu0 %v2571_v0 }
 0x56e   :  { %1958 = vmatprep.subr.bf16.mxu1 %v2249_v41 }
 0x570   :  { %2074 = vmatpush3.bf16.msra.mxu0 %v2248_v42 }
 0x571   :  { %1959 = vmatpush3.bf16.msra.mxu1 %v2250_v43  ;;  %2075 = vmatprep.subr.bf16.mxu0 %v2571_v0 }
 0x572   :  { %1960 = vmatprep.subr.bf16.mxu1 %v2252_v44 }
 0x574   :  { %2076 = vmatpush3.bf16.msra.mxu0 %v2251_v45 }
 0x575   :  { %1961 = vmatpush3.bf16.msra.mxu1 %v2253_v46  ;;  %2077 = vmatprep.subr.bf16.mxu0 %v2571_v0 }
 0x576   :  { %1962 = vmatprep.subr.bf16.mxu1 %v2255_v47 }
 0x578   :  { %2078 = vmatpush3.bf16.msra.mxu0 %v2254_v48 }
 0x579   :  { %1963 = vmatpush3.bf16.msra.mxu1 %v2256_v49  ;;  %2079 = vmatprep.subr.bf16.mxu0 %v2571_v0 }
 0x57a   :  { %1964 = vmatprep.subr.bf16.mxu1 %v2258_v51 }
 0x57c   :  { %2080 = vmatpush3.bf16.msra.mxu0 %v2257_v50 }
 0x57d   :  { %2081 = vmatprep.subr.bf16.mxu0 %v2571_v0  ;;  %1965 = vmatpush3.bf16.msra.mxu1 %v2259_v56 }
 0x57e   :  { %1966 = vmatprep.subr.bf16.mxu1 %v2261_v59 }
 0x580   :  { %2082 = vmatpush3.bf16.msra.mxu0 %v2260_v58 }
 0x581   :  { %2083 = vmatprep.subr.bf16.mxu0 %v2571_v0  ;;  %1967 = vmatpush3.bf16.msra.mxu1 %v2262_v60 }
 0x582   :  { %1968 = vmatprep.subr.bf16.mxu1 %v2264_v62 }
 0x584   :  { %2084 = vmatpush3.bf16.msra.mxu0 %v2263_v61 }
 0x585   :  { %2085 = vmatprep.subr.bf16.mxu0 %v2571_v0  ;;  %1969 = vmatpush3.bf16.msra.mxu1 %v2265_v63 }
 0x586   :  { %1970 = vmatprep.subr.bf16.mxu1 %v2267_v2 }
 0x588   :  { %2086 = vmatpush3.bf16.msra.mxu0 %v2266_v1 }
 0x589   :  { %1971 = vmatpush3.bf16.msra.mxu1 %v2268_v3 }
 0x61e   :  { %v1941_v4 = vpop.f32.mrb[20].mxu1 }
 0x61f   :  { %v1942_v5 = vpop.f32.mrb[21].mxu1 }
 0x620   :  { %v1943_v6 = vadd.f32 %v1942_v5, %v1941_v4  ;;  %v1944_v0 = vpop.f32.mrb[22].mxu1 }
 0x621   :  { %v1945_v7 = vpop.f32.mrb[23].mxu1 }
 0x622   :  { %v1330_v12 = vadd.f32 %v1943_v6, %v825_v9 }
 0x63e   :  { %v1288_v13 = vpop.f32.mrb[4].mxu0  ;;  %v1369_v14 = vpop.f32.mrb[24].mxu1 }
 0x63f   :  { %v2091_v15 = vadd.f32 %v1288_v13, %v817_v10  ;;  %v1370_v16 = vadd.f32 %v1369_v14, %v1330_v12  ;;  %v1290_v18 = vpop.f32.mrb[5].mxu0  ;;  %v2069_v19 = vpop.f32.mrb[25].mxu1 }
 0x640   :  { %v2092_v20 = vadd.f32 %v1290_v18, %v821_v11  ;;  %v1292_v21 = vpop.f32.mrb[6].mxu0  ;;  %v1372_v22 = vpop.f32.mrb[26].mxu1 }
 0x641   :  { %2283 = vtanh.f32 %v2091_v15  ;;  %v1293_v53 = vpop.f32.mrb[7].mxu0  ;;  %v2070_v23 = vpop.f32.mrb[27].mxu1 }
 0x642   :  { %2285 = vtanh.f32 %v1370_v16 }
 0x643   :  { %2287 = vtanh.f32 %v2092_v20 }
 0x64b   :  { %v2284_v17 = vpop.eup %2283 }
 0x64c   :  { %v2286_v55 = vpop.eup %2285  ;;  %v1426_v25 = vpack.c.bf16 %v2284_v17, %v2284_v17 }
 0x64d   :  { %v2288_v24 = vpop.eup %2287  ;;  %v1428_v54 = vpack.c.bf16 %v2286_v55, %v2286_v55 }
 0x64e   :  { %v1427_v57 = vpack.c.bf16 %v2288_v24, %v2288_v24 }
 0x64f   :  { %2088 = vmatmul.mubr.bf16.vlgmr.msra.gmra.mrb[8].mxu0 %v1428_v54 }
 0x650   :  { %1612 = vmatprep.mubr.bf16.mxu1 %v1427_v57 }
 0x651   :  { %1613 = vmatmul.mubr.bf16.vlgmr.msra.gmra.mrb[28].mxu1 %v1426_v25 }
 0x722   :  { %v1654_v27 = vpop.f32.mrb[8].mxu0 }
 0x723   :  { %v2089_v28 = vpop.f32.mrb[9].mxu0 }
 0x724   :  { %v1972_v29 = vpop.f32.mrb[28].mxu1  ;;  %v1657_v30 = vpop.f32.mrb[10].mxu0 }
 0x725   :  { %v1973_v32 = vpop.f32.mrb[29].mxu1  ;;  %v2090_v33 = vpop.f32.mrb[11].mxu0 }
 0x726   :  { %v1974_v34 = vadd.f32 %v1973_v32, %v1972_v29  ;;  %v1975_v35 = vpop.f32.mrb[30].mxu1 }
 0x727   :  { %v1976_v36 = vpop.f32.mrb[31].mxu1 }
 0x728   :  { %v1615_v37 = vadd.f32 %v1974_v34, %v1872_v31 }
 0x72a   :  { %v2986_v52 = vadd.f32 %v1654_v27, %v1615_v37 }
 0x72c   :  { %v1697_v38 = vsel %vm1696_vm5, %v2986_v52, -1e+30  ;;  %v1665_v39 = vsel %vm1663_vm6, %v2986_v52, -1e+30 }
 0x72d   :  { %1698 = vmax.xlane.f32.xlu0 %v1697_v38 }
 0x731   :  { %1666 = vmax.xlane.f32.xlu0 %v1665_v39 }
 0x7ba   :  { %v1699_v40 = vpop.xlane.xlu0 %1698 }
 0x7bb   :  { %v1700_v41 = vsub.f32 %v1697_v38, %v1699_v40  ;;  %vm1707_vm7 = vcmp.eq.f32.partialorder %v1697_v38, %v1699_v40 }
 0x7bc   :  { %v1708_v42 = vsel %vm1707_vm7, %v2977_v26, 2147483647 }
 0x7bd   :  { %v1701_v43 = vmul.f32 1.442695, %v1700_v41  ;;  %v1710_v44 = vshra.s32 %v1708_v42, 16  ;;  %v1709_v59 = vand.u32 65535, %v1708_v42 }
 0x7be   :  { %v1667_v45 = vpop.xlane.xlu0 %1666 }
 0x7bf   :  { %2289 = vpow2.f32 %v1701_v43  ;;  %v1668_v46 = vsub.f32 %v1665_v39, %v1667_v45  ;;  %vm1675_vm8 = vcmp.eq.f32.partialorder %v1665_v39, %v1667_v45  ;;  %v1712_v47 = vcvt.s32.f32 %v1710_v44 }
 0x7c0   :  { %v1676_v48 = vsel %vm1675_vm8, %v2977_v26, 2147483647  ;;  %v1711_v61 = vcvt.s32.f32 %v1709_v59 }
 0x7c1   :  { %v1669_v49 = vmul.f32 1.442695, %v1668_v46  ;;  %1713 = vmin.xlane.f32.xlu1 %v1712_v47  ;;  %v1678_v50 = vshra.s32 %v1676_v48, 16  ;;  %v1677_v62 = vand.u32 65535, %v1676_v48 }
 0x7c3   :  { %2291 = vpow2.f32 %v1669_v49  ;;  %v1680_v51 = vcvt.s32.f32 %v1678_v50  ;;  %v1679_v2 = vcvt.s32.f32 %v1677_v62 }
 0x7c5   :  { %1681 = vmin.xlane.f32.xlu1 %v1680_v51 }
 0x7c9   :  { %v2290_v56 = vpop.eup %2289 }
 0x7ca   :  { %1703 = vadd.xlane.f32.xlu0 %v2290_v56 }
 0x7cd   :  { %v2292_v58 = vpop.eup %2291 }
 0x7ce   :  { %1671 = vadd.xlane.f32.xlu1 %v2292_v58 }
 0x84e   :  { %v1714_v60 = vpop.xlane.xlu1 %1713 }
 0x84f   :  { %vm1715_vm9 = vcmp.eq.f32.partialorder %v1712_v47, %v1714_v60  ;;  %v1720_v6 = vcvt.f32.s32 %v1714_v60 }
 0x850   :  { %v1716_v63 = vsel %vm1715_vm9, %v1711_v61, inf }
 0x851   :  { %1717 = vmin.xlane.f32.xlu0 %v1716_v63  ;;  %v1721_v7 = vshll.u32 %v1720_v6, 16 }
 0x852   :  { %v1682_v1 = vpop.xlane.xlu1 %1681 }
 0x853   :  { %vm1683_vm10 = vcmp.eq.f32.partialorder %v1680_v51, %v1682_v1  ;;  %v1688_v8 = vcvt.f32.s32 %v1682_v1 }
 0x854   :  { %v1684_v3 = vsel %vm1683_vm10, %v1679_v2, inf }
 0x855   :  { %1685 = vmin.xlane.f32.xlu1 %v1684_v3  ;;  %v1689_v14 = vshll.u32 %v1688_v8, 16 }
 0x857   :  { %v1704_v4 = vpop.xlane.xlu0 %1703 }
 0x858   :  { %2293 = vlog2.f32 %v1704_v4 }
 0x85b   :  { %v1672_v5 = vpop.xlane.xlu1 %1671 }
 0x85c   :  { %2295 = vlog2.f32 %v1672_v5 }
 0x85d   :  { %2297 = vrcp.f32 %v1672_v5 }
 0x85e   :  { %2299 = vrcp.f32 %v1704_v4 }
 0x862   :  { %v2294_v10 = vpop.eup %2293 }
 0x863   :  { %v1724_v18 = vmul.f32 0.6931472, %v2294_v10 }
 0x865   :  { %v1725_v55 = vsub.f32 0.0, %v1724_v18 }
 0x866   :  { %v2296_v12 = vpop.eup %2295 }
 0x867   :  { %v2298_v19 = vpop.eup %2297  ;;  %v1692_v20 = vmul.f32 0.6931472, %v2296_v12 }
 0x868   :  { %v2300_v53 = vpop.eup %2299  ;;  %v1674_v24 = vmul.f32 %v2298_v19, %v2292_v58 }
 0x869   :  { %v1693_v54 = vsub.f32 0.0, %v1692_v20  ;;  %v1706_v27 = vmul.f32 %v2300_v53, %v2290_v56 }
 0x86b   :  { %v1737_v29 = vadd.f32 %v1706_v27, %v1674_v24 }
 0x8de   :  { %v1718_v0 = vpop.xlane.xlu0 %1717 }
 0x8df   :  { %v1719_v9 = vcvt.f32.s32 %v1718_v0 }
 0x8e1   :  { %v1722_v11 = vadd.s32 %v1721_v7, %v1719_v9 }
 0x8e2   :  { %v1686_v13 = vpop.xlane.xlu1 %1685 }
 0x8e3   :  { %v1897_v15 = vadd.s32 4294967280, %v1722_v11  ;;  %v1687_v16 = vcvt.f32.s32 %v1686_v13 }
 0x8e5   :  { %v1728_v21 = vcvt.s32.f32 %v1897_v15  ;;  %v1690_v22 = vadd.s32 %v1689_v14, %v1687_v16 }
 0x8e7   :  { %v1733_v23 = vsel %vm1732_vm11, %v1728_v21, 0.0  ;;  %v1726_v17 = vcvt.s32.f32 %v1690_v22 }
 0x8e9   :  { %v1734_v57 = vsel %vm1731_vm12, %v1726_v17, %v1733_v23 }
 0x8ea   :  { %v1735_v25 = vsel %vm1730_vm13, %v1725_v55, %v1734_v57 }
 0x8eb   :  { %v1736_v28 = vsel %vm1729_vm14, %v1693_v54, %v1735_v25 }
 0x8ec   :  { %v1738_v30 = vadd.f32 %v1736_v28, %v2986_v52 }
 0x8ee   :  { %v1739_v31 = vsel %vm1695_vm4, %v1737_v29, %v1738_v30 }
 0x8ef   :  { %1740 = vst [vmem:[#allocation19] sm:$0xff] %v1739_v31 }
 0x8f0   :  { %2532 = shalt.err (!%p2529_p0)
}
 0x8f1   :  { %s2533_s22 = scalar_lea.hbm %s3027_s15, 128 }
 0x8f2   :  { %p2534_p1 = scmp.ne.s32.totalorder %s3027_s15, %s2533_s22  ;;  %p2537_p2 = scmp.lt.u32.totalorder %s2533_s22, %s3027_s15 }
 0x8f4   :  { %p2539_p3 = pnand %p2537_p2, %p2534_p1 }
 0x8f6   :  { %2542 = shalt.err (!%p2539_p3)
}
 0x8f7   :  { %1750 = dma.vmem_to_hbm [thread:$0]  %s1748_s26, 128, %s3027_s15, [#allocation4]  }
 0x8f8   :  { %2555 = dma.done.wait [#allocation4], 128  }
 0x8f9   :  { %2556 = vsyncadd [#allocation4], 4294967168 }
 0x8fa   :  { %1754 = vsyncpa [#allocation3], 1 }
 0x8fb   :  { %1755 = vsyncpa [#allocation6], 1 }
 0x8fc   :  { %1756 = vsyncpa [#allocation9], 1 }
 0x8fd   :  { %1757 = vsyncpa [#allocation12], 1 }
 0x8fe   :  { %1758 = vsyncpa [#allocation15], 1 }
 0x8ff   :  { %1759 = vsyncpa [#allocation18], 1 }
 0x900   :  { %1760 = vsyncpa [#allocation4], 1 }

</bundles_post_ra>
